<compile_context>
chip_gen: v7x
topology: tpu7x:2x2x1
jax: 0.10.0
libtpu: 0.0.40
codegen_flags: <defaults>
</compile_context>

<pallas_src>
import functools

import jax
import jax.numpy as jnp
from jax.experimental import pallas as pl
from jax.experimental.pallas import tpu as pltpu


def _basic_block_kernel(x_ref, cache_ref, w_lin_ref, w_left_ref, w_right_ref,
                        w_aff_ref, b_aff_ref, out_ref, cache_out_ref, acc_ref,
                        *, lorder, rorder, lstride, rstride):
    # x_ref:        (bB, T, Dlin)   batch tile
    # cache_ref:    (bB, L0e, P)    L0e = max((lorder-1)*lstride, 1)
    # w_lin_ref:    (Dlin, P)       LinearTransform weight (bias=False)
    # w_left_ref:   (lorder, P)     depthwise causal FSMN filter
    # w_right_ref:  (Re, P)         depthwise lookahead filter, Re=max(rorder,1)
    # w_aff_ref:    (P, Dlin), b_aff_ref: (1, Dlin)   AffineTransform
    # out_ref:      (bB, T, Dlin)
    # cache_out_ref:(bB, L0e, P)    updated FSMN cache (aliased over cache input)
    # acc_ref:      (bB*T, P) f32   VMEM scratch holding the FSMN result
    bB, T, Dlin = x_ref.shape
    P = w_lin_ref.shape[1]
    L0 = (lorder - 1) * lstride
    M = bB * T

    # ---- 1) LinearTransform (bias=False): ONE MXU op over all bB*T rows -----
    # bf16 operands (native MXU throughput on v5e/v6e/v7x), f32 accumulation.
    x2d = x_ref[...].reshape(M, Dlin)
    x1 = jnp.dot(x2d.astype(jnp.bfloat16), w_lin_ref[...].astype(jnp.bfloat16),
                 preferred_element_type=jnp.float32)               # (M, P) f32

    # Loop-invariant prep, emitted exactly once (no per-batch unroll anymore).
    w_left = w_left_ref[...].astype(jnp.float32)                   # (lorder, P)
    # Per-row time index within each batch element's own T block.
    local_t = jax.lax.broadcasted_iota(jnp.int32, (bB, T, P), 1).reshape(M, P)

    # ---- 2) FSMNBlock, causal part, on the full (M, P) tile -----------------
    # out[t] = x1[t]*(1 + w_left[-1]) + sum_{k<lorder-1} w_left[k]*x1[t-d_k],
    # d_k = (lorder-1-k)*lstride.  Rows with local t < d_k (which would read
    # across the batch boundary) are masked here and patched from the cache
    # below as an L0-row correction: one roll per tap, no cache roll/concat.
    acc = x1 * (1.0 + w_left[lorder - 1:lorder, :])                # residual + d=0 tap
    for k in range(lorder - 1):
        d = (lorder - 1 - k) * lstride                             # 0 < d <= L0 <= T
        shifted = jnp.where(local_t >= d, pltpu.roll(x1, d, axis=0), 0.0)
        acc = acc + shifted * w_left[k:k + 1, :]

    # Lookahead part: sum_k w_right[k] * x1[t + (k+1)*rstride], zero past T.
    if rorder > 0:
        w_right = w_right_ref[...].astype(jnp.float32)             # (rorder, P)
        for k in range(rorder):
            s = (k + 1) * rstride
            if s >= T:
                continue                                           # only reads padding
            shifted = jnp.where(local_t < T - s,
                                pltpu.roll(x1, M - s, axis=0),     # x1[t + s]
                                0.0)
            acc = acc + shifted * w_right[k:k + 1, :]

    # ---- 2b) cache correction (first L0 rows of each batch) + new cache -----
    if L0 > 0:
        acc_ref[...] = acc
        for b in range(bB):                                        # bB small, static
            cache_b = cache_ref[b].astype(jnp.float32)             # (L0, P)
            corr = jnp.zeros((L0, P), jnp.float32)
            for k in range(lorder - 1):
                d = (lorder - 1 - k) * lstride
                # rows t in [0, d) take w_left[k] * cache[L0 - d + t]
                piece = cache_b[L0 - d:L0, :] * w_left[k:k + 1, :]  # (d, P)
                if d < L0:
                    piece = jnp.concatenate(
                        [piece, jnp.zeros((L0 - d, P), jnp.float32)], axis=0)
                corr = corr + piece
            acc_ref[b * T:b * T + L0, :] = acc[b * T:b * T + L0, :] + corr
            # last L0 frames of concat(cache, x1) == x1 tail (T >= L0 asserted).
            cache_out_ref[b] = x1[(b + 1) * T - L0:(b + 1) * T, :].astype(
                cache_out_ref.dtype)
        x2 = acc_ref[...]
    else:
        # TODO(synk): lorder == 1 makes the PyTorch `[-0:]` cache slice keep the
        # whole sequence; here the (dummy) cache is just passed through.
        cache_out_ref[...] = cache_ref[...]
        x2 = acc

    # ---- 3) AffineTransform + 4) ReLU: one fused MXU op + one dense store ---
    y = jnp.dot(x2.astype(jnp.bfloat16), w_aff_ref[...].astype(jnp.bfloat16),
                preferred_element_type=jnp.float32) + b_aff_ref[...]
    out_ref[...] = jnp.maximum(y, 0.0).reshape(bB, T, Dlin).astype(out_ref.dtype)


def _default_batch_tile(B):
    """Batch-tile heuristic.

    v5e/v6e (single TensorCore): one grid step (batch_tile = B) -- pays the
    per-step overhead once and fills the MXU M dimension with B*T rows.
    v7x (2 TensorCores): split the batch across cores, preferring >=2 steps
    per core (B//4 when possible) so BlockSpec double-buffering overlaps DMA
    with compute.
    """
    try:
        kind = jax.devices()[0].device_kind.lower()
    except Exception:  # pragma: no cover - defensive
        kind = ""
    if "v7" in kind and B % 2 == 0 and B >= 2:
        return B // 4 if B % 4 == 0 else B // 2
    return B


def basic_block_forward(x, cache, params, *, lorder, rorder, lstride, rstride,
                        batch_tile=None):
    B, T, Dlin = x.shape
    P = params["w_lin"].shape[1]
    L0 = (lorder - 1) * lstride
    L0e = cache.shape[1]
    Re = params["w_right"].shape[0]

    assert L0e == max(L0, 1), "cache must carry exactly (lorder-1)*lstride frames"
    assert T >= L0, "chunks shorter than the left context are not supported"
    assert T % 8 == 0, "pad T to a multiple of 8 (sublane) outside the kernel"

    if batch_tile is None:
        batch_tile = _default_batch_tile(B)
    assert B % batch_tile == 0
    nb = B // batch_tile
    bB = batch_tile

    kernel = functools.partial(
        _basic_block_kernel,
        lorder=lorder, rorder=rorder, lstride=lstride, rstride=rstride)

    out, new_cache = pl.pallas_call(
        kernel,
        out_shape=(jax.ShapeDtypeStruct((B, T, Dlin), x.dtype),
                   jax.ShapeDtypeStruct((B, L0e, P), cache.dtype)),
        grid_spec=pltpu.PrefetchScalarGridSpec(
            num_scalar_prefetch=0,
            grid=(nb,),
            in_specs=[
                pl.BlockSpec((bB, T, Dlin), lambda g: (g, 0, 0)),
                pl.BlockSpec((bB, L0e, P), lambda g: (g, 0, 0)),
                pl.BlockSpec((Dlin, P), lambda g: (0, 0)),
                pl.BlockSpec((lorder, P), lambda g: (0, 0)),
                pl.BlockSpec((Re, P), lambda g: (0, 0)),
                pl.BlockSpec((P, Dlin), lambda g: (0, 0)),
                pl.BlockSpec((1, Dlin), lambda g: (0, 0)),
            ],
            out_specs=(
                pl.BlockSpec((bB, T, Dlin), lambda g: (g, 0, 0)),
                pl.BlockSpec((bB, L0e, P), lambda g: (g, 0, 0)),
            ),
            scratch_shapes=[pltpu.VMEM((bB * T, P), jnp.float32)],
        ),
        # Updated cache is written in place over the incoming cache buffer
        # (the caller must treat that buffer as donated).
        input_output_aliases={1: 1},
        compiler_params=pltpu.CompilerParams(
            dimension_semantics=("parallel",),
            # Explicit VMEM budget; also fits v7x's 64 MiB physical VMEM.
            vmem_limit_bytes=32 * 1024 * 1024,
        ),
    )(x, cache, params["w_lin"], params["w_left"], params["w_right"],
      params["w_aff"], params["b_aff"])
    return out, new_cache


def basic_block_reference(x, cache, params, *, lorder, rorder, lstride, rstride):
    """Pure-JAX f32 reference mirroring PyTorch BasicBlock.forward semantics."""
    hi = jax.lax.Precision.HIGHEST
    B, T, _ = x.shape
    x1 = jnp.einsum("btd,dp->btp", x, params["w_lin"], precision=hi)  # (B, T, P)
    L0 = (lorder - 1) * lstride
    concat = jnp.concatenate([cache[:, :L0, :], x1], axis=1)          # (B, L0+T, P)
    new_cache = concat[:, -L0:, :] if L0 > 0 else cache
    y_left = jnp.zeros_like(x1)
    for k in range(lorder):
        s = k * lstride
        y_left = y_left + concat[:, s:s + T, :] * params["w_left"][k][None, None, :]
    out = x1 + y_left
    if rorder > 0:
        pad = jnp.zeros((B, rorder * rstride, x1.shape[-1]), x1.dtype)
        x1p = jnp.concatenate([x1, pad], axis=1)
        y_right = jnp.zeros_like(x1)
        for k in range(rorder):
            s = (k + 1) * rstride
            y_right = y_right + x1p[:, s:s + T, :] * params["w_right"][k][None, None, :]
        out = out + y_right
    x3 = jnp.einsum("btp,pd->btd", out, params["w_aff"], precision=hi) + params["b_aff"][None]
    return jnp.maximum(x3, 0.0), new_cache


if __name__ == "__main__":
    # Small but MXU/lane-friendly shapes: bB*T rows map onto the MXU M
    # dimension, channel dims are multiples of 128 (lane-dense loads/stores).
    B, T = 2, 128
    linear_dim, proj_dim = 128, 128
    lorder, rorder, lstride, rstride = 3, 2, 1, 1
    L0 = (lorder - 1) * lstride

    key = jax.random.PRNGKey(0)
    k_x, k_lin, k_l, k_r, k_aff, k_b = jax.random.split(key, 6)

    x = jax.random.normal(k_x, (B, T, linear_dim), jnp.float32)
    # First call in PyTorch: cache is zeros (B, P, L0, 1) -> here (B, L0, P).
    cache0 = jnp.zeros((B, max(L0, 1), proj_dim), jnp.float32)

    params = {
        "w_lin":   0.1 * jax.random.normal(k_lin, (linear_dim, proj_dim), jnp.float32),
        "w_left":  0.1 * jax.random.normal(k_l, (lorder, proj_dim), jnp.float32),
        "w_right": 0.1 * jax.random.normal(k_r, (max(rorder, 1), proj_dim), jnp.float32),
        "w_aff":   0.1 * jax.random.normal(k_aff, (proj_dim, linear_dim), jnp.float32),
        "b_aff":   0.1 * jax.random.normal(k_b, (1, linear_dim), jnp.float32),
    }

    ref_out, ref_cache = basic_block_reference(
        x, cache0, params,
        lorder=lorder, rorder=rorder, lstride=lstride, rstride=rstride)

    # Pass a fresh cache buffer to the kernel: it is donated (aliased onto the
    # updated-cache output) and overwritten in place.
    out, new_cache = basic_block_forward(
        x, jnp.zeros_like(cache0), params,
        lorder=lorder, rorder=rorder, lstride=lstride, rstride=rstride)
    out, new_cache = jax.block_until_ready((out, new_cache))

    assert out.shape == (B, T, linear_dim)
    assert new_cache.shape == (B, max(L0, 1), proj_dim)
    # Tolerance accounts for bf16 MXU operands (f32 accumulation) vs the
    # f32 HIGHEST-precision reference.
    assert jnp.allclose(out, ref_out, atol=4e-2, rtol=4e-2), "output mismatch vs reference"
    assert jnp.allclose(new_cache, ref_cache, atol=4e-2, rtol=4e-2), "cache mismatch vs reference"

    print("KERNEL_OK")
</pallas_src>

<mosaic_0001>
module attributes {stable_mosaic.version = 11 : i64} {
  func.func @_basic_block_kernel(%arg0: i32, %arg1: memref<2x128x128xf32, #tpu.memory_space<vmem>>, %arg2: memref<2x2x128xf32, #tpu.memory_space<vmem>>, %arg3: memref<128x128xf32, #tpu.memory_space<vmem>>, %arg4: memref<3x128xf32, #tpu.memory_space<vmem>>, %arg5: memref<2x128xf32, #tpu.memory_space<vmem>>, %arg6: memref<128x128xf32, #tpu.memory_space<vmem>>, %arg7: memref<1x128xf32, #tpu.memory_space<vmem>>, %arg8: memref<2x128x128xf32, #tpu.memory_space<vmem>>, %arg9: memref<2x2x128xf32, #tpu.memory_space<vmem>>, %arg10: memref<256x128xf32, #tpu.memory_space<vmem>>) attributes {dimension_semantics = [#tpu.dimension_semantics<parallel>], iteration_bounds = array<i64: 1>, scalar_prefetch = 0 : i64, scratch_operands = 1 : i64, tpu.core_type = #tpu.core_type<tc>, window_params = [{transform_indices = @transform_0, window_bounds = array<i64: 2, 128, 128>}, {transform_indices = @transform_1, window_bounds = array<i64: 2, 2, 128>}, {pipeline_mode = #tpu.pipeline_mode<synchronous>, transform_indices = @transform_2, window_bounds = array<i64: 128, 128>}, {pipeline_mode = #tpu.pipeline_mode<synchronous>, transform_indices = @transform_3, window_bounds = array<i64: 3, 128>}, {pipeline_mode = #tpu.pipeline_mode<synchronous>, transform_indices = @transform_4, window_bounds = array<i64: 2, 128>}, {pipeline_mode = #tpu.pipeline_mode<synchronous>, transform_indices = @transform_5, window_bounds = array<i64: 128, 128>}, {pipeline_mode = #tpu.pipeline_mode<synchronous>, transform_indices = @transform_6, window_bounds = array<i64: 1, 128>}, {transform_indices = @transform_7, window_bounds = array<i64: 2, 128, 128>}, {transform_indices = @transform_8, window_bounds = array<i64: 2, 2, 128>}]} {
    %c0 = arith.constant 0 : index
    %c0_0 = arith.constant 0 : index
    %c0_1 = arith.constant 0 : index
    %0 = vector.load %arg1[%c0, %c0_0, %c0_1] : memref<2x128x128xf32, #tpu.memory_space<vmem>>, vector<2x128x128xf32>
    %1 = vector.shape_cast %0 : vector<2x128x128xf32> to vector<256x128xf32>
    %2 = arith.truncf %1 : vector<256x128xf32> to vector<256x128xbf16>
    %c0_2 = arith.constant 0 : index
    %c0_3 = arith.constant 0 : index
    %3 = vector.load %arg3[%c0_2, %c0_3] : memref<128x128xf32, #tpu.memory_space<vmem>>, vector<128x128xf32>
    %4 = arith.truncf %3 : vector<128x128xf32> to vector<128x128xbf16>
    %cst = arith.constant dense<0.000000e+00> : vector<256x128xf32>
    %5 = tpu.matmul %2, %4, %cst {dimension_numbers = #tpu.dot_dimension_numbers<[1], [0], [0], [1], [0, 0, 1, 1], [], []>} : vector<256x128xbf16>, vector<128x128xbf16>, vector<256x128xf32> -> vector<256x128xf32>
    %c0_4 = arith.constant 0 : index
    %c0_5 = arith.constant 0 : index
    %6 = vector.load %arg4[%c0_4, %c0_5] : memref<3x128xf32, #tpu.memory_space<vmem>>, vector<3x128xf32>
    %7 = tpu.iota {dimensions = array<i32: 1>} : vector<2x128x128xi32>
    %8 = vector.shape_cast %7 : vector<2x128x128xi32> to vector<256x128xi32>
    %9 = vector.extract_strided_slice %6 {offsets = [2, 0], sizes = [1, 128], strides = [1, 1]} : vector<3x128xf32> to vector<1x128xf32>
    %cst_6 = arith.constant 1.000000e+00 : f32
    %10 = vector.broadcast %cst_6 : f32 to vector<1x128xf32>
    %11 = arith.addf %10, %9 : vector<1x128xf32>
    %12 = vector.broadcast %11 : vector<1x128xf32> to vector<256x128xf32>
    %13 = arith.mulf %5, %12 : vector<256x128xf32>
    %c2_i32 = arith.constant 2 : i32
    %14 = vector.broadcast %c2_i32 : i32 to vector<256x128xi32>
    %15 = arith.cmpi sge, %8, %14 : vector<256x128xi32>
    %c2_i32_7 = arith.constant 2 : i32
    %16 = tpu.dynamic_rotate %5 by %c2_i32_7 dim 0 : vector<256x128xf32>, i32 -> vector<256x128xf32>
    %cst_8 = arith.constant 0.000000e+00 : f32
    %17 = vector.broadcast %cst_8 : f32 to vector<256x128xf32>
    %18 = arith.select %15, %16, %17 : vector<256x128xi1>, vector<256x128xf32>
    %19 = vector.extract_strided_slice %6 {offsets = [0, 0], sizes = [1, 128], strides = [1, 1]} : vector<3x128xf32> to vector<1x128xf32>
    %20 = vector.broadcast %19 : vector<1x128xf32> to vector<256x128xf32>
    %21 = arith.mulf %18, %20 : vector<256x128xf32>
    %22 = arith.addf %13, %21 : vector<256x128xf32>
    %c1_i32 = arith.constant 1 : i32
    %23 = vector.broadcast %c1_i32 : i32 to vector<256x128xi32>
    %24 = arith.cmpi sge, %8, %23 : vector<256x128xi32>
    %c1_i32_9 = arith.constant 1 : i32
    %25 = tpu.dynamic_rotate %5 by %c1_i32_9 dim 0 : vector<256x128xf32>, i32 -> vector<256x128xf32>
    %cst_10 = arith.constant 0.000000e+00 : f32
    %26 = vector.broadcast %cst_10 : f32 to vector<256x128xf32>
    %27 = arith.select %24, %25, %26 : vector<256x128xi1>, vector<256x128xf32>
    %28 = vector.extract_strided_slice %6 {offsets = [1, 0], sizes = [1, 128], strides = [1, 1]} : vector<3x128xf32> to vector<1x128xf32>
    %29 = vector.broadcast %28 : vector<1x128xf32> to vector<256x128xf32>
    %30 = arith.mulf %27, %29 : vector<256x128xf32>
    %31 = arith.addf %22, %30 : vector<256x128xf32>
    %c0_11 = arith.constant 0 : index
    %c0_12 = arith.constant 0 : index
    %32 = vector.load %arg5[%c0_11, %c0_12] : memref<2x128xf32, #tpu.memory_space<vmem>>, vector<2x128xf32>
    %c127_i32 = arith.constant 127 : i32
    %33 = vector.broadcast %c127_i32 : i32 to vector<256x128xi32>
    %34 = arith.cmpi slt, %8, %33 : vector<256x128xi32>
    %c255_i32 = arith.constant 255 : i32
    %35 = tpu.dynamic_rotate %5 by %c255_i32 dim 0 : vector<256x128xf32>, i32 -> vector<256x128xf32>
    %cst_13 = arith.constant 0.000000e+00 : f32
    %36 = vector.broadcast %cst_13 : f32 to vector<256x128xf32>
    %37 = arith.select %34, %35, %36 : vector<256x128xi1>, vector<256x128xf32>
    %38 = vector.extract_strided_slice %32 {offsets = [0, 0], sizes = [1, 128], strides = [1, 1]} : vector<2x128xf32> to vector<1x128xf32>
    %39 = vector.broadcast %38 : vector<1x128xf32> to vector<256x128xf32>
    %40 = arith.mulf %37, %39 : vector<256x128xf32>
    %41 = arith.addf %31, %40 : vector<256x128xf32>
    %c126_i32 = arith.constant 126 : i32
    %42 = vector.broadcast %c126_i32 : i32 to vector<256x128xi32>
    %43 = arith.cmpi slt, %8, %42 : vector<256x128xi32>
    %c254_i32 = arith.constant 254 : i32
    %44 = tpu.dynamic_rotate %5 by %c254_i32 dim 0 : vector<256x128xf32>, i32 -> vector<256x128xf32>
    %cst_14 = arith.constant 0.000000e+00 : f32
    %45 = vector.broadcast %cst_14 : f32 to vector<256x128xf32>
    %46 = arith.select %43, %44, %45 : vector<256x128xi1>, vector<256x128xf32>
    %47 = vector.extract_strided_slice %32 {offsets = [1, 0], sizes = [1, 128], strides = [1, 1]} : vector<2x128xf32> to vector<1x128xf32>
    %48 = vector.broadcast %47 : vector<1x128xf32> to vector<256x128xf32>
    %49 = arith.mulf %46, %48 : vector<256x128xf32>
    %50 = arith.addf %41, %49 : vector<256x128xf32>
    %c0_15 = arith.constant 0 : index
    %c0_16 = arith.constant 0 : index
    %51 = vector.load %arg10[%c0_15, %c0_16] : memref<256x128xf32, #tpu.memory_space<vmem>>, vector<256x128xf32>
    tpu.vector_store %arg10[%c0_15, %c0_16], %50 {strides = array<i32>} : memref<256x128xf32, #tpu.memory_space<vmem>>, vector<256x128xf32>,
    %c0_17 = arith.constant 0 : index
    %c0_18 = arith.constant 0 : index
    %c0_19 = arith.constant 0 : index
    %52 = vector.load %arg2[%c0_17, %c0_18, %c0_19] : memref<2x2x128xf32, #tpu.memory_space<vmem>>, vector<1x2x128xf32>
    %53 = vector.shape_cast %52 : vector<1x2x128xf32> to vector<2x128xf32>
    %cst_20 = arith.constant 0.000000e+00 : f32
    %54 = vector.broadcast %cst_20 : f32 to vector<2x128xf32>
    %55 = vector.extract_strided_slice %6 {offsets = [0, 0], sizes = [1, 128], strides = [1, 1]} : vector<3x128xf32> to vector<1x128xf32>
    %56 = vector.broadcast %55 : vector<1x128xf32> to vector<2x128xf32>
    %57 = arith.mulf %53, %56 : vector<2x128xf32>
    %58 = arith.addf %54, %57 : vector<2x128xf32>
    %59 = vector.extract_strided_slice %53 {offsets = [1, 0], sizes = [1, 128], strides = [1, 1]} : vector<2x128xf32> to vector<1x128xf32>
    %60 = vector.extract_strided_slice %6 {offsets = [1, 0], sizes = [1, 128], strides = [1, 1]} : vector<3x128xf32> to vector<1x128xf32>
    %61 = arith.mulf %59, %60 : vector<1x128xf32>
    %cst_21 = arith.constant 0.000000e+00 : f32
    %62 = vector.broadcast %cst_21 : f32 to vector<1x128xf32>
    %63 = tpu.concatenate %61, %62 in 0 : vector<1x128xf32>, vector<1x128xf32> -> vector<2x128xf32>
    %64 = arith.addf %58, %63 : vector<2x128xf32>
    %65 = vector.extract_strided_slice %50 {offsets = [0, 0], sizes = [2, 128], strides = [1, 1]} : vector<256x128xf32> to vector<2x128xf32>
    %66 = arith.addf %65, %64 : vector<2x128xf32>
    %c0_22 = arith.constant 0 : index
    %c0_23 = arith.constant 0 : index
    %67 = vector.load %arg10[%c0_22, %c0_23] : memref<256x128xf32, #tpu.memory_space<vmem>>, vector<2x128xf32>
    tpu.vector_store %arg10[%c0_22, %c0_23], %66 {strides = array<i32>} : memref<256x128xf32, #tpu.memory_space<vmem>>, vector<2x128xf32>,
    %68 = vector.extract_strided_slice %5 {offsets = [126, 0], sizes = [2, 128], strides = [1, 1]} : vector<256x128xf32> to vector<2x128xf32>
    %c0_24 = arith.constant 0 : index
    %c0_25 = arith.constant 0 : index
    %c0_26 = arith.constant 0 : index
    %69 = vector.load %arg9[%c0_24, %c0_25, %c0_26] : memref<2x2x128xf32, #tpu.memory_space<vmem>>, vector<1x2x128xf32>
    %70 = vector.shape_cast %69 : vector<1x2x128xf32> to vector<2x128xf32>
    %71 = vector.shape_cast %68 : vector<2x128xf32> to vector<1x2x128xf32>
    tpu.vector_store %arg9[%c0_24, %c0_25, %c0_26], %71 {strides = array<i32>} : memref<2x2x128xf32, #tpu.memory_space<vmem>>, vector<1x2x128xf32>,
    %c1 = arith.constant 1 : index
    %c0_27 = arith.constant 0 : index
    %c0_28 = arith.constant 0 : index
    %72 = vector.load %arg2[%c1, %c0_27, %c0_28] : memref<2x2x128xf32, #tpu.memory_space<vmem>>, vector<1x2x128xf32>
    %73 = vector.shape_cast %72 : vector<1x2x128xf32> to vector<2x128xf32>
    %cst_29 = arith.constant 0.000000e+00 : f32
    %74 = vector.broadcast %cst_29 : f32 to vector<2x128xf32>
    %75 = vector.extract_strided_slice %6 {offsets = [0, 0], sizes = [1, 128], strides = [1, 1]} : vector<3x128xf32> to vector<1x128xf32>
    %76 = vector.broadcast %75 : vector<1x128xf32> to vector<2x128xf32>
    %77 = arith.mulf %73, %76 : vector<2x128xf32>
    %78 = arith.addf %74, %77 : vector<2x128xf32>
    %79 = vector.extract_strided_slice %73 {offsets = [1, 0], sizes = [1, 128], strides = [1, 1]} : vector<2x128xf32> to vector<1x128xf32>
    %80 = vector.extract_strided_slice %6 {offsets = [1, 0], sizes = [1, 128], strides = [1, 1]} : vector<3x128xf32> to vector<1x128xf32>
    %81 = arith.mulf %79, %80 : vector<1x128xf32>
    %cst_30 = arith.constant 0.000000e+00 : f32
    %82 = vector.broadcast %cst_30 : f32 to vector<1x128xf32>
    %83 = tpu.concatenate %81, %82 in 0 : vector<1x128xf32>, vector<1x128xf32> -> vector<2x128xf32>
    %84 = arith.addf %78, %83 : vector<2x128xf32>
    %85 = vector.extract_strided_slice %50 {offsets = [128, 0], sizes = [2, 128], strides = [1, 1]} : vector<256x128xf32> to vector<2x128xf32>
    %86 = arith.addf %85, %84 : vector<2x128xf32>
    %c128 = arith.constant 128 : index
    %c0_31 = arith.constant 0 : index
    %87 = vector.load %arg10[%c128, %c0_31] : memref<256x128xf32, #tpu.memory_space<vmem>>, vector<2x128xf32>
    tpu.vector_store %arg10[%c128, %c0_31], %86 {strides = array<i32>} : memref<256x128xf32, #tpu.memory_space<vmem>>, vector<2x128xf32>,
    %88 = vector.extract_strided_slice %5 {offsets = [254, 0], sizes = [2, 128], strides = [1, 1]} : vector<256x128xf32> to vector<2x128xf32>
    %c1_32 = arith.constant 1 : index
    %c0_33 = arith.constant 0 : index
    %c0_34 = arith.constant 0 : index
    %89 = vector.load %arg9[%c1_32, %c0_33, %c0_34] : memref<2x2x128xf32, #tpu.memory_space<vmem>>, vector<1x2x128xf32>
    %90 = vector.shape_cast %89 : vector<1x2x128xf32> to vector<2x128xf32>
    %91 = vector.shape_cast %88 : vector<2x128xf32> to vector<1x2x128xf32>
    tpu.vector_store %arg9[%c1_32, %c0_33, %c0_34], %91 {strides = array<i32>} : memref<2x2x128xf32, #tpu.memory_space<vmem>>, vector<1x2x128xf32>,
    %c0_35 = arith.constant 0 : index
    %c0_36 = arith.constant 0 : index
    %92 = vector.load %arg10[%c0_35, %c0_36] : memref<256x128xf32, #tpu.memory_space<vmem>>, vector<256x128xf32>
    %93 = arith.truncf %92 : vector<256x128xf32> to vector<256x128xbf16>
    %c0_37 = arith.constant 0 : index
    %c0_38 = arith.constant 0 : index
    %94 = vector.load %arg6[%c0_37, %c0_38] : memref<128x128xf32, #tpu.memory_space<vmem>>, vector<128x128xf32>
    %95 = arith.truncf %94 : vector<128x128xf32> to vector<128x128xbf16>
    %cst_39 = arith.constant dense<0.000000e+00> : vector<256x128xf32>
    %96 = tpu.matmul %93, %95, %cst_39 {dimension_numbers = #tpu.dot_dimension_numbers<[1], [0], [0], [1], [0, 0, 1, 1], [], []>} : vector<256x128xbf16>, vector<128x128xbf16>, vector<256x128xf32> -> vector<256x128xf32>
    %c0_40 = arith.constant 0 : index
    %c0_41 = arith.constant 0 : index
    %97 = vector.load %arg7[%c0_40, %c0_41] : memref<1x128xf32, #tpu.memory_space<vmem>>, vector<1x128xf32>
    %98 = vector.broadcast %97 : vector<1x128xf32> to vector<256x128xf32>
    %99 = arith.addf %96, %98 : vector<256x128xf32>
    %cst_42 = arith.constant 0.000000e+00 : f32
    %100 = vector.broadcast %cst_42 : f32 to vector<256x128xf32>
    %101 = arith.maximumf %99, %100 : vector<256x128xf32>
    %102 = vector.shape_cast %101 : vector<256x128xf32> to vector<2x128x128xf32>
    %c0_43 = arith.constant 0 : index
    %c0_44 = arith.constant 0 : index
    %c0_45 = arith.constant 0 : index
    %103 = vector.load %arg8[%c0_43, %c0_44, %c0_45] : memref<2x128x128xf32, #tpu.memory_space<vmem>>, vector<2x128x128xf32>
    tpu.vector_store %arg8[%c0_43, %c0_44, %c0_45], %102 {strides = array<i32>} : memref<2x128x128xf32, #tpu.memory_space<vmem>>, vector<2x128x128xf32>,
    return
  }
  func.func @transform_0(%arg0: i32) -> (i32, i32, i32) {
    %c0_i32 = arith.constant 0 : i32
    %c0_i32_0 = arith.constant 0 : i32
    %c0_i32_1 = arith.constant 0 : i32
    return %arg0, %c0_i32, %c0_i32_0 : i32, i32, i32
  }
  func.func @transform_1(%arg0: i32) -> (i32, i32, i32) {
    %c0_i32 = arith.constant 0 : i32
    %c0_i32_0 = arith.constant 0 : i32
    %c0_i32_1 = arith.constant 0 : i32
    return %arg0, %c0_i32, %c0_i32_0 : i32, i32, i32
  }
  func.func @transform_2(%arg0: i32) -> (i32, i32) {
    %c0_i32 = arith.constant 0 : i32
    %c0_i32_0 = arith.constant 0 : i32
    %c0_i32_1 = arith.constant 0 : i32
    return %c0_i32, %c0_i32_0 : i32, i32
  }
  func.func @transform_3(%arg0: i32) -> (i32, i32) {
    %c0_i32 = arith.constant 0 : i32
    %c0_i32_0 = arith.constant 0 : i32
    %c0_i32_1 = arith.constant 0 : i32
    return %c0_i32, %c0_i32_0 : i32, i32
  }
  func.func @transform_4(%arg0: i32) -> (i32, i32) {
    %c0_i32 = arith.constant 0 : i32
    %c0_i32_0 = arith.constant 0 : i32
    %c0_i32_1 = arith.constant 0 : i32
    return %c0_i32, %c0_i32_0 : i32, i32
  }
  func.func @transform_5(%arg0: i32) -> (i32, i32) {
    %c0_i32 = arith.constant 0 : i32
    %c0_i32_0 = arith.constant 0 : i32
    %c0_i32_1 = arith.constant 0 : i32
    return %c0_i32, %c0_i32_0 : i32, i32
  }
  func.func @transform_6(%arg0: i32) -> (i32, i32) {
    %c0_i32 = arith.constant 0 : i32
    %c0_i32_0 = arith.constant 0 : i32
    %c0_i32_1 = arith.constant 0 : i32
    return %c0_i32, %c0_i32_0 : i32, i32
  }
  func.func @transform_7(%arg0: i32) -> (i32, i32, i32) {
    %c0_i32 = arith.constant 0 : i32
    %c0_i32_0 = arith.constant 0 : i32
    %c0_i32_1 = arith.constant 0 : i32
    return %arg0, %c0_i32, %c0_i32_0 : i32, i32, i32
  }
  func.func @transform_8(%arg0: i32) -> (i32, i32, i32) {
    %c0_i32 = arith.constant 0 : i32
    %c0_i32_0 = arith.constant 0 : i32
    %c0_i32_1 = arith.constant 0 : i32
    return %arg0, %c0_i32, %c0_i32_0 : i32, i32, i32
  }
}

</mosaic_0001>

<bundles_post_ra>
// kernel: tpu_custom_call.1
= control target key start
LH: loop header
LB: loop body
LE: loop exit
PB: predicated region body
PF: predicated region fallthrough
CT: control target
= control target key end

     0   :  { %14 = vsyncpa [#allocation4], 0  ;;  %s2899_s0 = inlined_call_operand.hbm [shape: f32[2,128,128], index: 0, kind: input, shape index: {}]   ;;  %s2900_s1 = inlined_call_operand.hbm [shape: f32[2,2,128], index: 1, kind: input, shape index: {}, may-alias: {1,8}]   ;;  %s2901_s2 = inlined_call_operand.hbm [shape: f32[128,128], index: 2, kind: input, shape index: {}]   ;;  %s2902_s3 = inlined_call_operand.vmem [shape: f32[3,128], index: 3, kind: input, shape index: {}]   ;;  %s2903_s4 = inlined_call_operand.vmem [shape: f32[2,128], index: 4, kind: input, shape index: {}]   ;;  %s2904_s5 = inlined_call_operand.hbm [shape: f32[128,128], index: 5, kind: input, shape index: {}]   ;;  %s2905_s6 = inlined_call_operand.vmem [shape: f32[1,128], index: 6, kind: input, shape index: {}]   ;;  %s2906_s7 = inlined_call_operand.hbm [shape: f32[2,128,128], index: 7, kind: output, shape index: {0}]   ;;  %s2907_s8 = inlined_call_operand.hbm [shape: f32[2,2,128], index: 8, kind: output, shape index: {1}, may-alias: {1,8}]  }
   0x1   :  { %15 = vsyncpa [#allocation7], 0 }
   0x2   :  { %16 = vsyncpa [#allocation10], 0 }
   0x3   :  { %17 = vsyncpa [#allocation5], 0 }
   0x4   :  { %18 = vsyncpa [#allocation13], 0  ;;  %s1794_s27 = smov [#allocation6]   ;;  %s1652_s9 = scalar_lea.hbm %s2900_s1, 64 }
   0x5   :  { %s36_s28 = sshll.u32 %s1794_s27, 4  ;;  %p1653_p0 = scmp.ne.s32.totalorder %s2900_s1, %s1652_s9  ;;  %s37_s28 = int_to_ptr.vmem [resolvable:$true] %s36_s28 }
   0x6   :  { %p1656_p1 = scmp.lt.u32.totalorder %s1652_s9, %s2900_s1 }
   0x8   :  { %p1658_p2 = pnand %p1656_p1, %p1653_p0 }
   0xa   :  { %1661 = shalt.err (!%p1658_p2)
}
   0xb   :  { %s1662_s14 = scalar_lea.vmem %s37_s28, 64  ;;  %p1667_p4 = scmp.lt.s32.totalorder %s37_s28, %s37_s28 }
   0xc   :  { %p1663_p3 = scmp.ne.s32.totalorder %s37_s28, %s1662_s14  ;;  %p1668_p5 = scmp.lt.s32.totalorder %s1662_s14, %s1662_s14 }
   0xe   :  { %p1669_p6 = por %p1668_p5, %p1667_p4 }
  0x10   :  { %p1670_p7 = pnand %p1669_p6, %p1663_p3 }
  0x12   :  { %1673 = shalt.err (!%p1670_p7)
}
  0x13   :  { %s1795_s15 = smov 32   ;;  %s1796_s16 = smov 2  }
  0x14   :  { %42 = dma.hbm_to_vmem [thread:$0]  %s2900_s1, 64, %s37_s28, [#allocation7], %s1795_s15, %s1795_s15, %s1796_s16  }
  0x15   :  { %s1797_s19 = smov [#allocation3]   ;;  %s1674_s23 = scalar_lea.hbm %s2899_s0, 4096 }
  0x16   :  { %s24_s20 = sshll.u32 %s1797_s19, 4  ;;  %p1675_p8 = scmp.ne.s32.totalorder %s2899_s0, %s1674_s23  ;;  %s25_s20 = int_to_ptr.vmem [resolvable:$true] %s24_s20 }
  0x17   :  { %p1678_p9 = scmp.lt.u32.totalorder %s1674_s23, %s2899_s0 }
  0x19   :  { %p1680_p10 = pnand %p1678_p9, %p1675_p8 }
  0x1b   :  { %1683 = shalt.err (!%p1680_p10)
}
  0x1c   :  { %s1684_s29 = scalar_lea.vmem %s25_s20, 4096  ;;  %p1689_p12 = scmp.lt.s32.totalorder %s25_s20, %s25_s20 }
  0x1d   :  { %p1685_p11 = scmp.ne.s32.totalorder %s25_s20, %s1684_s29  ;;  %p1690_p13 = scmp.lt.s32.totalorder %s1684_s29, %s1684_s29 }
  0x1f   :  { %p1691_p0 = por %p1690_p13, %p1689_p12 }
  0x21   :  { %p1692_p1 = pnand %p1691_p0, %p1685_p11 }
  0x23   :  { %1695 = shalt.err (!%p1692_p1)
}
  0x24   :  { %s1798_s1 = smov 128   ;;  %s1799_s28 = smov 8  }
  0x25   :  { %30 = dma.hbm_to_vmem [thread:$0]  %s2899_s0, 4096, %s25_s20, [#allocation4], %s1798_s1, %s1798_s1, %s1799_s28  }
  0x26   :  { %s1800_s10 = smov [#allocation8]   ;;  %s1801_s12 = smov [#allocation9]  }
  0x27   :  { %s48_s11 = sshll.u32 %s1800_s10, 4  ;;  %s64_s13 = sshll.u32 %s1801_s12, 4  ;;  %s49_s11 = int_to_ptr.vmem [resolvable:$true] %s48_s11  ;;  %s1879_s13 = int_to_ptr.vmem [resolvable:$true] %s64_s13 }
  0x28   :  { %s1696_s18 = scalar_lea.hbm %s2901_s2, 2048 }
  0x29   :  { %p1697_p2 = scmp.ne.s32.totalorder %s2901_s2, %s1696_s18  ;;  %p1700_p3 = scmp.lt.u32.totalorder %s1696_s18, %s2901_s2 }
  0x2b   :  { %p1702_p4 = pnand %p1700_p3, %p1697_p2 }
  0x2d   :  { %1705 = shalt.err (!%p1702_p4)
}
  0x2e   :  { %s1706_s0 = scalar_lea.vmem %s49_s11, 2048  ;;  %p1711_p6 = scmp.lt.s32.totalorder %s49_s11, %s49_s11 }
  0x2f   :  { %p1707_p5 = scmp.ne.s32.totalorder %s49_s11, %s1706_s0  ;;  %p1712_p7 = scmp.lt.s32.totalorder %s1706_s0, %s1706_s0 }
  0x31   :  { %p1713_p8 = por %p1712_p7, %p1711_p6 }
  0x33   :  { %p1714_p9 = pnand %p1713_p8, %p1707_p5 }
  0x35   :  { %1717 = shalt.err (!%p1714_p9)
}
  0x36   :  { %54 = dma.hbm_to_vmem [thread:$0]  %s2901_s2, 2048, %s49_s11, [#allocation7], %s1798_s1, %s1798_s1, %s1799_s28  }
  0x37   :  { %s1718_s27 = scalar_lea.hbm %s2904_s5, 2048 }
  0x38   :  { %p1719_p10 = scmp.ne.s32.totalorder %s2904_s5, %s1718_s27  ;;  %p1722_p11 = scmp.lt.u32.totalorder %s1718_s27, %s2904_s5 }
  0x3a   :  { %p1724_p12 = pnand %p1722_p11, %p1719_p10 }
  0x3c   :  { %1727 = shalt.err (!%p1724_p12)
}
  0x3d   :  { %s1728_s12 = scalar_lea.vmem %s1879_s13, 2048  ;;  %p1733_p0 = scmp.lt.s32.totalorder %s1879_s13, %s1879_s13 }
  0x3e   :  { %p1729_p13 = scmp.ne.s32.totalorder %s1879_s13, %s1728_s12  ;;  %p1734_p1 = scmp.lt.s32.totalorder %s1728_s12, %s1728_s12 }
  0x40   :  { %p1735_p2 = por %p1734_p1, %p1733_p0 }
  0x42   :  { %p1736_p3 = pnand %p1735_p2, %p1729_p13 }
  0x44   :  { %1739 = shalt.err (!%p1736_p3)
}
  0x45   :  { %70 = dma.hbm_to_vmem [thread:$0]  %s2904_s5, 2048, %s1879_s13, [#allocation10], %s1798_s1, %s1798_s1, %s1799_s28  }
  0x46   :  { %1784 = dma.done.wait [#allocation4], 4096  }
  0x47   :  { %1785 = vsyncadd [#allocation4], 4294963200 }
  0x48   :  { %1786 = dma.done.wait [#allocation7], 2112  }
  0x49   :  { %1787 = vsyncadd [#allocation7], 4294965184 }
  0x4a   :  { %1788 = dma.done.wait [#allocation10], 2048  }
  0x4b   :  { %1789 = vsyncadd [#allocation10], 4294965248  ;;  %v134_v0 = vld [vmem:[#allocation8] sm:$0xff]  ;;  %v135_v1 = vld [vmem:[#allocation8 + $0x8] sm:$0xff]  ;;  %vm1138_vm0 = vcmask 1040384  }
  0x4c   :  { %v136_v2 = vld [vmem:[#allocation8 + $0x10] sm:$0xff]  ;;  %v150_v3 = vpack.c.bf16 %v135_v1, %v134_v0  ;;  %v137_v4 = vld [vmem:[#allocation8 + $0x18] sm:$0xff]  ;;  %v138_v6 = vld [vmem:[#allocation8 + $0x20] sm:$0xff] }
  0x4d   :  { %v151_v5 = vpack.c.bf16 %v137_v4, %v136_v2  ;;  %v139_v7 = vld [vmem:[#allocation8 + $0x28] sm:$0xff]  ;;  %v86_v9 = vld [vmem:[#allocation3] sm:$0xff]  ;;  %v140_v11 = vld [vmem:[#allocation8 + $0x30] sm:$0xff] }
  0x4e   :  { %1546 = vmatprep.subr.bf16.mxu0 %v150_v3  ;;  %v152_v8 = vpack.c.bf16 %v139_v7, %v138_v6  ;;  %v87_v10 = vld [vmem:[#allocation3 + $0x8] sm:$0xff]  ;;  %v141_v12 = vld [vmem:[#allocation8 + $0x38] sm:$0xff]  ;;  %v144_v18 = vld [vmem:[#allocation8 + $0x50] sm:$0xff] }
  0x4f   :  { %1547 = vmatpush3.bf16.msra.mxu0 %v150_v3  ;;  %v118_v13 = vpack.c.bf16 %v87_v10, %v86_v9  ;;  %v153_v14 = vpack.c.bf16 %v141_v12, %v140_v11  ;;  %v142_v15 = vld [vmem:[#allocation8 + $0x40] sm:$0xff]  ;;  %v143_v16 = vld [vmem:[#allocation8 + $0x48] sm:$0xff]  ;;  %v145_v19 = vld [vmem:[#allocation8 + $0x58] sm:$0xff]  ;;  %v320_v10 = vlaneseq }
  0x50   :  { %1548 = vmatprep.subr.bf16.mxu0 %v151_v5  ;;  %v154_v17 = vpack.c.bf16 %v143_v16, %v142_v15  ;;  %v155_v20 = vpack.c.bf16 %v145_v19, %v144_v18  ;;  %v146_v21 = vld [vmem:[#allocation8 + $0x60] sm:$0xff]  ;;  %v147_v22 = vld [vmem:[#allocation8 + $0x68] sm:$0xff]  ;;  %v148_v24 = vld [vmem:[#allocation8 + $0x70] sm:$0xff] }
  0x51   :  { %1562 = vmatprep.mubr.bf16.mxu0 %v118_v13  ;;  %v156_v23 = vpack.c.bf16 %v147_v22, %v146_v21  ;;  %v149_v25 = vld [vmem:[#allocation8 + $0x78] sm:$0xff]  ;;  %v88_v27 = vld [vmem:[#allocation3 + $0x10] sm:$0xff]  ;;  %v91_v30 = vld [vmem:[#allocation3 + $0x28] sm:$0xff]  ;;  %v1919_v15 = vshrl.u32 %v320_v10, 7 }
  0x52   :  { %v157_v26 = vpack.c.bf16 %v149_v25, %v148_v24  ;;  %v89_v28 = vld [vmem:[#allocation3 + $0x18] sm:$0xff]  ;;  %v90_v29 = vld [vmem:[#allocation3 + $0x20] sm:$0xff]  ;;  %v92_v33 = vld [vmem:[#allocation3 + $0x30] sm:$0xff] }
  0x53   :  { %1549 = vmatpush3.bf16.msra.mxu0 %v151_v5  ;;  %v119_v31 = vpack.c.bf16 %v89_v28, %v88_v27  ;;  %v120_v32 = vpack.c.bf16 %v91_v30, %v90_v29  ;;  %v93_v34 = vld [vmem:[#allocation3 + $0x38] sm:$0xff]  ;;  %v94_v35 = vld [vmem:[#allocation3 + $0x40] sm:$0xff]  ;;  %v95_v36 = vld [vmem:[#allocation3 + $0x48] sm:$0xff]  ;;  %v489_v18 = vsub.s32 0, %v1919_v15  ;;  %vm422_vm1 = vcmp.lt.s32.totalorder %v1919_v15, 2 }
  0x54   :  { %1550 = vmatprep.subr.bf16.mxu0 %v152_v8  ;;  %v121_v37 = vpack.c.bf16 %v93_v34, %v92_v33  ;;  %v122_v38 = vpack.c.bf16 %v95_v36, %v94_v35  ;;  %v96_v39 = vld [vmem:[#allocation3 + $0x50] sm:$0xff]  ;;  %v97_v40 = vld [vmem:[#allocation3 + $0x58] sm:$0xff]  ;;  %v98_v41 = vld [vmem:[#allocation3 + $0x60] sm:$0xff]  ;;  %vm603_vm2 = vcmp.lt.s32.totalorder %v1919_v15, 1  ;;  %vm785_vm3 = vcmp.lt.s32.totalorder %v1919_v15, 7 }
  0x55   :  { %v99_v42 = vld [vmem:[#allocation3 + $0x68] sm:$0xff]  ;;  %v123_v43 = vpack.c.bf16 %v97_v40, %v96_v39  ;;  %v100_v45 = vld [vmem:[#allocation3 + $0x70] sm:$0xff]  ;;  %v101_v46 = vld [vmem:[#allocation3 + $0x78] sm:$0xff]  ;;  %vm966_vm4 = vcmp.lt.s32.totalorder %v1919_v15, 6  ;;  %vm374_vm5 = vcmp.ge.s32.totalorder %v1919_v15, 2  ;;  %vm555_vm6 = vcmp.ge.s32.totalorder %v1919_v15, 1 }
  0x56   :  { %v124_v44 = vpack.c.bf16 %v99_v42, %v98_v41  ;;  %v102_v47 = vld [vmem:[#allocation3 + $0x80] sm:$0xff]  ;;  %v103_v48 = vld [vmem:[#allocation3 + $0x88] sm:$0xff]  ;;  %v125_v49 = vpack.c.bf16 %v101_v46, %v100_v45  ;;  %v104_v51 = vld [vmem:[#allocation3 + $0x90] sm:$0xff] }
  0x57   :  { %1551 = vmatpush3.bf16.msra.mxu0 %v152_v8  ;;  %v126_v50 = vpack.c.bf16 %v103_v48, %v102_v47  ;;  %v105_v52 = vld [vmem:[#allocation3 + $0x98] sm:$0xff]  ;;  %v106_v53 = vld [vmem:[#allocation3 + $0xa0] sm:$0xff]  ;;  %v107_v54 = vld [vmem:[#allocation3 + $0xa8] sm:$0xff] }
  0x58   :  { %1552 = vmatprep.subr.bf16.mxu0 %v153_v14  ;;  %v127_v55 = vpack.c.bf16 %v105_v52, %v104_v51  ;;  %v128_v56 = vpack.c.bf16 %v107_v54, %v106_v53  ;;  %v108_v57 = vld [vmem:[#allocation3 + $0xb0] sm:$0xff]  ;;  %v109_v58 = vld [vmem:[#allocation3 + $0xb8] sm:$0xff]  ;;  %v110_v59 = vld [vmem:[#allocation3 + $0xc0] sm:$0xff] }
  0x59   :  { %v111_v60 = vld [vmem:[#allocation3 + $0xc8] sm:$0xff]  ;;  %v129_v61 = vpack.c.bf16 %v109_v58, %v108_v57  ;;  %v112_v63 = vld [vmem:[#allocation3 + $0xd0] sm:$0xff]  ;;  %v113_v0 = vld [vmem:[#allocation3 + $0xd8] sm:$0xff] }
  0x5a   :  { %v130_v62 = vpack.c.bf16 %v111_v60, %v110_v59  ;;  %v114_v1 = vld [vmem:[#allocation3 + $0xe0] sm:$0xff]  ;;  %v115_v2 = vld [vmem:[#allocation3 + $0xe8] sm:$0xff]  ;;  %v131_v3 = vpack.c.bf16 %v113_v0, %v112_v63  ;;  %v116_v5 = vld [vmem:[#allocation3 + $0xf0] sm:$0xff] }
  0x5b   :  { %1553 = vmatpush3.bf16.msra.mxu0 %v153_v14  ;;  %v132_v4 = vpack.c.bf16 %v115_v2, %v114_v1  ;;  %v117_v6 = vld [vmem:[#allocation3 + $0xf8] sm:$0xff]  ;;  %v1206_v8 = vld [vmem:[#allocation9] sm:$0xff]  ;;  %v1207_v9 = vld [vmem:[#allocation9 + $0x8] sm:$0xff] }
  0x5c   :  { %1554 = vmatprep.subr.bf16.mxu0 %v154_v17  ;;  %v133_v7 = vpack.c.bf16 %v117_v6, %v116_v5  ;;  %v1222_v11 = vpack.c.bf16 %v1207_v9, %v1206_v8  ;;  %v1131_v12 = vld [vmem:[#allocation6] sm:$0x3]  ;;  %v1145_v13 = vld [vmem:[#allocation6 + $0x2] sm:$0x3] }
  0x5d   :  { %v319_v14 = vld [vmem:[%s2902_s3] sm:$0x7] }
  0x5e   :  { %1594 = vmatprep.subr.bf16.mxu1 %v1222_v11  ;;  %v1134_v16 = vmul.f32 %v1131_v12, %v319_v14  ;;  %v337_v19 = vadd.f32 1.0, %v319_v14  ;;  %v1209_v24 = vld [vmem:[#allocation9 + $0x18] sm:$0xff]  ;;  %v1923_v25 = vrot.slane %v319_v14, %v489_v18 }
  0x5f   :  { %1555 = vmatpush3.bf16.msra.mxu0 %v154_v17  ;;  %1595 = vmatpush3.bf16.msra.mxu1 %v1222_v11  ;;  %v1148_v17 = vmul.f32 %v1145_v13, %v319_v14  ;;  %v736_v29 = vld [vmem:[%s2903_s4] sm:$0x3]  ;;  %s1802_s4 = smov [#allocation12]  }
  0x60   :  { %1556 = vmatprep.subr.bf16.mxu0 %v155_v20  ;;  %v1136_v21 = vrot.slane %v1134_v16, 1  ;;  %v1132_v30 = vmul.f32 %v1131_v12, %v1923_v25  ;;  %v1940_v36 = vrot.slane %v736_v29, %v489_v18  ;;  %s1479_s17 = sshll.u32 %s1802_s4, 4  ;;  %s1480_s17 = int_to_ptr.vmem [resolvable:$true] %s1479_s17 }
  0x61   :  { %v1150_v22 = vrot.slane %v1148_v17, 1  ;;  %s1740_s18 = scalar_lea.vmem %s1480_s17, 64  ;;  %p1745_p5 = scmp.lt.s32.totalorder %s1480_s17, %s1480_s17 }
  0x62   :  { %p1741_p4 = scmp.ne.s32.totalorder %s1480_s17, %s1740_s18  ;;  %p1746_p6 = scmp.lt.s32.totalorder %s1740_s18, %s1740_s18 }
  0x63   :  { %1557 = vmatpush3.bf16.msra.mxu0 %v155_v20  ;;  %v340_v20 = vsub.s32 2, %v1919_v15  ;;  %v1152_v33 = vsel %vm1138_vm0, %v1150_v22, 0.0 }
  0x64   :  { %1558 = vmatprep.subr.bf16.mxu0 %v156_v23  ;;  %p1747_p7 = por %p1746_p6, %p1745_p5 }
  0x65   :  { %v1926_v28 = vrot.slane %v337_v19, %v340_v20 }
  0x66   :  { %p1748_p8 = pnand %p1747_p7, %p1741_p4 }
  0x67   :  { %1559 = vmatpush3.bf16.msra.mxu0 %v156_v23  ;;  %v1208_v23 = vld [vmem:[#allocation9 + $0x10] sm:$0xff] }
  0x68   :  { %1560 = vmatprep.subr.bf16.mxu0 %v157_v26  ;;  %v1223_v27 = vpack.c.bf16 %v1209_v24, %v1208_v23 }
  0x6a   :  { %1596 = vmatprep.subr.bf16.mxu1 %v1223_v27 }
  0x6b   :  { %1561 = vmatpush3.bf16.msra.mxu0 %v157_v26  ;;  %v670_v26 = vsub.s32 1, %v1919_v15  ;;  %1597 = vmatpush3.bf16.msra.mxu1 %v1223_v27 }
  0x6d   :  { %v1935_v34 = vrot.slane %v319_v14, %v670_v26 }
  0x6e   :  { %1563 = vmatmul.mubr.bf16.vlgmr.msra.gmra.mrb[0].mxu0 %v119_v31  ;;  %v1146_v31 = vmul.f32 %v1145_v13, %v1923_v25 }
  0x6f   :  { %1566 = vmatprep.mubr.bf16.mxu0 %v120_v32  ;;  %v1139_v32 = vsel %vm1138_vm0, %v1136_v21, 0.0 }
  0x70   :  { %v1953_v42 = vadd.f32 %v1139_v32, %v1132_v30 }
  0x76   :  { %1567 = vmatmul.mubr.bf16.gmra.mrb[4].mxu0 %v121_v37  ;;  %v1943_v37 = vrot.slane %v736_v29, %v670_v26 }
  0x77   :  { %1570 = vmatprep.mubr.bf16.mxu0 %v122_v38  ;;  %v1946_v38 = vadd.s32 120, %v1919_v15  ;;  %v1214_v15 = vld [vmem:[#allocation9 + $0x40] sm:$0xff] }
  0x79   :  { %vm752_vm7 = vcmp.lt.s32.totalorder %v1946_v38, 127  ;;  %vm933_vm8 = vcmp.lt.s32.totalorder %v1946_v38, 126 }
  0x7e   :  { %1571 = vmatmul.mubr.bf16.gmra.mrb[8].mxu0 %v123_v43  ;;  %v1955_v43 = vadd.f32 %v1152_v33, %v1146_v31 }
  0x7f   :  { %1574 = vmatprep.mubr.bf16.mxu0 %v124_v44 }
  0x86   :  { %1575 = vmatmul.mubr.bf16.gmra.mrb[12].mxu0 %v125_v49 }
  0x87   :  { %1578 = vmatprep.mubr.bf16.mxu0 %v126_v50 }
  0x8e   :  { %1579 = vmatmul.mubr.bf16.gmra.mrb[16].mxu0 %v127_v55 }
  0x8f   :  { %1582 = vmatprep.mubr.bf16.mxu0 %v128_v56 }
  0x96   :  { %1583 = vmatmul.mubr.bf16.gmra.mrb[20].mxu0 %v129_v61 }
  0x97   :  { %1586 = vmatprep.mubr.bf16.mxu0 %v130_v62 }
  0x9e   :  { %1587 = vmatmul.mubr.bf16.gmra.mrb[24].mxu0 %v131_v3 }
  0x9f   :  { %1590 = vmatprep.mubr.bf16.mxu0 %v132_v4 }
  0xa6   :  { %1591 = vmatmul.mubr.bf16.gmra.mrb[28].mxu0 %v133_v7 }
 0x141   :  { %v1938_v35 = vpop.f32.mrb[0].mxu0 }
 0x142   :  { %v344_v39 = vmul.f32 %v1938_v35, %v1926_v28  ;;  %v392_v40 = vrot.slane %v1938_v35, 6  ;;  %v1951_v41 = vpop.f32.mrb[1].mxu0  ;;  %v573_v44 = vrot.slane %v1938_v35, 7  ;;  %v755_v45 = vrot.slane %v1938_v35, 1 }
 0x143   :  { %v936_v46 = vrot.slane %v1938_v35, 2  ;;  %v1962_v47 = vmul.f32 %v1926_v28, %v1951_v41  ;;  %v1964_v48 = vpop.f32.mrb[2].mxu0  ;;  %v2911_v49 = vrot.slane %v1951_v41, 6  ;;  %v2910_v50 = vrot.slane %v1951_v41, 7 }
 0x144   :  { %v2909_v51 = vrot.slane %v1951_v41, 1  ;;  %v393_v52 = vrot.slane %v1964_v48, 6  ;;  %v195_v53 = vpop.f32.mrb[3].mxu0  ;;  %v345_v54 = vmul.f32 %v1964_v48, %v1926_v28  ;;  %v574_v55 = vrot.slane %v1964_v48, 7 }
 0x145   :  { %v756_v56 = vrot.slane %v1964_v48, 1  ;;  %v937_v57 = vrot.slane %v1964_v48, 2  ;;  %v391_v59 = vrot.slane %v195_v53, 6  ;;  %v572_v60 = vrot.slane %v195_v53, 7 }
 0x146   :  { %v451_v58 = vsel %vm422_vm1, %v392_v40, %v393_v52  ;;  %v754_v61 = vrot.slane %v195_v53, 1  ;;  %v632_v63 = vsel %vm603_vm2, %v573_v44, %v574_v55  ;;  %v2908_v2 = vrot.slane %v1951_v41, 2 }
 0x147   :  { %v494_v62 = vmul.f32 %v1923_v25, %v451_v58  ;;  %v814_v0 = vsel %vm785_vm3, %v755_v45, %v756_v56  ;;  %v995_v1 = vsel %vm966_vm4, %v936_v46, %v937_v57  ;;  %v675_v3 = vmul.f32 %v1935_v34, %v632_v63 }
 0x148   :  { %v343_v4 = vmul.f32 %v1926_v28, %v195_v53  ;;  %v452_v5 = vsel %vm422_vm1, %v391_v59, %v392_v40  ;;  %v453_v7 = vsel %vm422_vm1, %v2911_v49, %v391_v59  ;;  %v633_v9 = vsel %vm603_vm2, %v572_v60, %v573_v44 }
 0x149   :  { %v526_v6 = vadd.f32 %v494_v62, %v345_v54  ;;  %v493_v8 = vmul.f32 %v1923_v25, %v452_v5  ;;  %v2000_v10 = vpop.f32.mrb[4].mxu0  ;;  %v856_v11 = vmul.f32 %v1940_v36, %v814_v0  ;;  %v492_v12 = vmul.f32 %v1923_v25, %v453_v7 }
 0x14a   :  { %v634_v13 = vsel %vm603_vm2, %v2910_v50, %v572_v60  ;;  %v815_v14 = vsel %vm785_vm3, %v754_v61, %v755_v45  ;;  %v2010_v16 = vpop.f32.mrb[5].mxu0  ;;  %v674_v19 = vmul.f32 %v1935_v34, %v633_v9  ;;  %v816_v20 = vsel %vm785_vm3, %v2909_v51, %v754_v61 }
 0x14b   :  { %v707_v17 = vadd.f32 %v675_v3, %v526_v6  ;;  %v525_v18 = vadd.f32 %v493_v8, %v344_v39  ;;  %v2017_v21 = vpop.f32.mrb[6].mxu0  ;;  %v1037_v22 = vmul.f32 %v1943_v37, %v995_v1  ;;  %v524_v23 = vadd.f32 %v492_v12, %v343_v4 }
 0x14c   :  { %v673_v24 = vmul.f32 %v1935_v34, %v634_v13  ;;  %v935_v26 = vrot.slane %v195_v53, 2  ;;  %v2021_v27 = vpop.f32.mrb[7].mxu0  ;;  %v2024_v30 = vmul.f32 %v1940_v36, %v816_v20  ;;  %v855_v31 = vmul.f32 %v1940_v36, %v815_v14 }
 0x14d   :  { %v706_v29 = vadd.f32 %v674_v19, %v525_v18  ;;  %v2029_v32 = vmul.f32 %v2000_v10, %v1926_v28  ;;  %v396_v40 = vrot.slane %v2000_v10, 6  ;;  %v577_v53 = vrot.slane %v2000_v10, 7 }
 0x14e   :  { %v705_v33 = vadd.f32 %v673_v24, %v524_v23  ;;  %v996_v35 = vsel %vm966_vm4, %v935_v26, %v936_v46  ;;  %v997_v39 = vsel %vm966_vm4, %v2908_v2, %v935_v26  ;;  %v759_v54 = vrot.slane %v2000_v10, 1 }
 0x14f   :  { %v888_v44 = vadd.f32 %v856_v11, %v706_v29  ;;  %v1036_v45 = vmul.f32 %v1943_v37, %v996_v35  ;;  %v940_v59 = vrot.slane %v2000_v10, 2  ;;  %v394_v60 = vrot.slane %v2010_v16, 6 }
 0x150   :  { %v887_v58 = vadd.f32 %v855_v31, %v705_v33  ;;  %v575_v46 = vrot.slane %v2010_v16, 7  ;;  %v346_v62 = vmul.f32 %v1926_v28, %v2010_v16  ;;  %v757_v63 = vrot.slane %v2010_v16, 1 }
 0x151   :  { %v1069_v61 = vadd.f32 %v1037_v22, %v888_v44  ;;  %v938_v0 = vrot.slane %v2010_v16, 2  ;;  %v2048_v1 = vpop.f32.mrb[8].mxu0  ;;  %v450_v4 = vsel %vm422_vm1, %v393_v52, %v394_v60  ;;  %v397_v6 = vrot.slane %v2017_v21, 6 }
 0x152   :  { %v1068_v3 = vadd.f32 %v1036_v45, %v887_v58  ;;  %v631_v5 = vsel %vm603_vm2, %v574_v55, %v575_v46  ;;  %v2055_v7 = vpop.f32.mrb[9].mxu0  ;;  %v495_v8 = vmul.f32 %v1923_v25, %v450_v4  ;;  %v813_v9 = vsel %vm785_vm3, %v756_v56, %v757_v63 }
 0x153   :  { %1101 = vst [vmem:[#allocation2 + $0x10] sm:$0xff] %v1069_v61  ;;  %v994_v52 = vsel %vm966_vm4, %v937_v57, %v938_v0  ;;  %v349_v55 = vmul.f32 %v2017_v21, %v1926_v28  ;;  %v2070_v11 = vpop.f32.mrb[10].mxu0  ;;  %v676_v12 = vmul.f32 %v1935_v34, %v631_v5  ;;  %v857_v13 = vmul.f32 %v1940_v36, %v813_v9 }
 0x154   :  { %1100 = vst [vmem:[#allocation2 + $0x8] sm:$0xff] %v1068_v3  ;;  %v447_v56 = vsel %vm422_vm1, %v396_v40, %v397_v6  ;;  %v578_v48 = vrot.slane %v2017_v21, 7  ;;  %v2079_v14 = vpop.f32.mrb[11].mxu0  ;;  %v527_v57 = vadd.f32 %v495_v8, %v346_v62  ;;  %v760_v19 = vrot.slane %v2017_v21, 1 }
 0x155   :  { %v498_v18 = vmul.f32 %v1923_v25, %v447_v56  ;;  %v941_v20 = vrot.slane %v2017_v21, 2  ;;  %v889_v22 = vadd.f32 %v857_v13, %v707_v17  ;;  %v1038_v23 = vmul.f32 %v1943_v37, %v994_v52 }
 0x156   :  { %v628_v24 = vsel %vm603_vm2, %v577_v53, %v578_v48  ;;  %v395_v26 = vrot.slane %v2021_v27, 6  ;;  %v708_v29 = vadd.f32 %v676_v12, %v527_v57  ;;  %v810_v17 = vsel %vm785_vm3, %v759_v54, %v760_v19 }
 0x157   :  { %v530_v31 = vadd.f32 %v498_v18, %v349_v55  ;;  %v679_v33 = vmul.f32 %v1935_v34, %v628_v24  ;;  %v2098_v35 = vmul.f32 %v1943_v37, %v997_v39  ;;  %v1070_v44 = vadd.f32 %v1038_v23, %v889_v22 }
 0x158   :  { %v991_v45 = vsel %vm966_vm4, %v940_v59, %v941_v20  ;;  %v448_v58 = vsel %vm422_vm1, %v395_v26, %v396_v40  ;;  %v347_v62 = vmul.f32 %v1926_v28, %v2021_v27  ;;  %v449_v39 = vsel %vm422_vm1, %v394_v60, %v395_v26 }
 0x159   :  { %v2108_v61 = vadd.f32 %v679_v33, %v530_v31  ;;  %v497_v3 = vmul.f32 %v1923_v25, %v448_v58  ;;  %v2115_v4 = vpop.f32.mrb[12].mxu0  ;;  %1102 = vst [vmem:[#allocation2 + $0x18] sm:$0xff] %v1070_v44  ;;  %v496_v5 = vmul.f32 %v1923_v25, %v449_v39  ;;  %v576_v8 = vrot.slane %v2021_v27, 7 }
 0x15a   :  { %v758_v9 = vrot.slane %v2021_v27, 1  ;;  %v939_v40 = vrot.slane %v2021_v27, 2  ;;  %v2121_v52 = vpop.f32.mrb[13].mxu0  ;;  %v860_v55 = vmul.f32 %v1940_v36, %v810_v17  ;;  %v1041_v12 = vmul.f32 %v1943_v37, %v991_v45 }
 0x15b   :  { %v529_v60 = vadd.f32 %v497_v3, %v2029_v32  ;;  %v400_v13 = vrot.slane %v2048_v1, 6  ;;  %v2127_v56 = vpop.f32.mrb[14].mxu0  ;;  %v528_v57 = vadd.f32 %v496_v5, %v347_v62  ;;  %v629_v18 = vsel %vm603_vm2, %v576_v8, %v577_v53 }
 0x15c   :  { %v630_v22 = vsel %vm603_vm2, %v575_v46, %v576_v8  ;;  %v811_v27 = vsel %vm785_vm3, %v758_v9, %v759_v54  ;;  %1143 = vst [vmem:[#allocation12 - $0x6] sm:$0xc0] %v2127_v56  ;;  %v2138_v23 = vpop.f32.mrb[15].mxu0  ;;  %v678_v24 = vmul.f32 %v1935_v34, %v629_v18  ;;  %v812_v26 = vsel %vm785_vm3, %v757_v63, %v758_v9 }
 0x15d   :  { %v677_v32 = vmul.f32 %v1935_v34, %v630_v22  ;;  %v581_v53 = vrot.slane %v2048_v1, 7  ;;  %v858_v46 = vmul.f32 %v1940_v36, %v812_v26  ;;  %v859_v31 = vmul.f32 %v1940_v36, %v811_v27 }
 0x15e   :  { %v992_v54 = vsel %vm966_vm4, %v939_v40, %v940_v59  ;;  %v993_v33 = vsel %vm966_vm4, %v938_v0, %v939_v40  ;;  %v710_v44 = vadd.f32 %v678_v24, %v529_v60  ;;  %v763_v45 = vrot.slane %v2048_v1, 1 }
 0x15f   :  { %v709_v17 = vadd.f32 %v677_v32, %v528_v57  ;;  %v1039_v63 = vmul.f32 %v1943_v37, %v993_v33  ;;  %v890_v58 = vadd.f32 %v858_v46, %v708_v29  ;;  %v1040_v62 = vmul.f32 %v1943_v37, %v992_v54 }
 0x160   :  { %v944_v39 = vrot.slane %v2048_v1, 2  ;;  %v398_v10 = vrot.slane %v2055_v7, 6  ;;  %v892_v59 = vadd.f32 %v860_v55, %v710_v44  ;;  %v579_v16 = vrot.slane %v2055_v7, 7 }
 0x161   :  { %v891_v3 = vadd.f32 %v859_v31, %v709_v17  ;;  %v761_v5 = vrot.slane %v2055_v7, 1  ;;  %v2162_v0 = vpop.f32.mrb[16].mxu0  ;;  %v1071_v8 = vadd.f32 %v1039_v63, %v890_v58  ;;  %v350_v9 = vmul.f32 %v1926_v28, %v2055_v7 }
 0x162   :  { %v446_v29 = vsel %vm422_vm1, %v397_v6, %v398_v10  ;;  %v942_v40 = vrot.slane %v2055_v7, 2  ;;  %v2171_v60 = vpop.f32.mrb[17].mxu0  ;;  %v1073_v57 = vadd.f32 %v1041_v12, %v892_v59  ;;  %v627_v22 = vsel %vm603_vm2, %v578_v48, %v579_v16 }
 0x163   :  { %v1072_v55 = vadd.f32 %v1040_v62, %v891_v3  ;;  %v499_v18 = vmul.f32 %v1923_v25, %v446_v29  ;;  %v2178_v27 = vpop.f32.mrb[18].mxu0  ;;  %1103 = vst [vmem:[#allocation2 + $0x20] sm:$0xff] %v1071_v8  ;;  %v809_v6 = vsel %vm785_vm3, %v760_v19, %v761_v5  ;;  %v353_v12 = vmul.f32 %v2070_v11, %v1926_v28 }
 0x164   :  { %v990_v7 = vsel %vm966_vm4, %v941_v20, %v942_v40  ;;  %v401_v32 = vrot.slane %v2070_v11, 6  ;;  %v2191_v24 = vpop.f32.mrb[19].mxu0  ;;  %1105 = vst [vmem:[#allocation2 + $0x30] sm:$0xff] %v1073_v57  ;;  %v680_v26 = vmul.f32 %v1935_v34, %v627_v22  ;;  %v861_v46 = vmul.f32 %v1940_v36, %v809_v6 }
 0x165   :  { %1104 = vst [vmem:[#allocation2 + $0x28] sm:$0xff] %v1072_v55  ;;  %v531_v48 = vadd.f32 %v499_v18, %v350_v9  ;;  %v582_v19 = vrot.slane %v2070_v11, 7  ;;  %v1042_v21 = vmul.f32 %v1943_v37, %v990_v7  ;;  %v764_v31 = vrot.slane %v2070_v11, 1 }
 0x166   :  { %v443_v20 = vsel %vm422_vm1, %v400_v13, %v401_v32  ;;  %v945_v54 = vrot.slane %v2070_v11, 2  ;;  %v893_v17 = vadd.f32 %v861_v46, %v2108_v61  ;;  %v352_v58 = vmul.f32 %v2048_v1, %v1926_v28 }
 0x167   :  { %v712_v33 = vadd.f32 %v680_v26, %v531_v48  ;;  %v502_v44 = vmul.f32 %v1923_v25, %v443_v20  ;;  %v624_v63 = vsel %vm603_vm2, %v581_v53, %v582_v19  ;;  %v806_v62 = vsel %vm785_vm3, %v763_v45, %v764_v31 }
 0x168   :  { %v987_v61 = vsel %vm966_vm4, %v944_v39, %v945_v54  ;;  %v399_v3 = vrot.slane %v2079_v14, 6  ;;  %v1074_v59 = vadd.f32 %v1042_v21, %v893_v17  ;;  %v683_v9 = vmul.f32 %v1935_v34, %v624_v63 }
 0x169   :  { %v534_v8 = vadd.f32 %v502_v44, %v353_v12  ;;  %v351_v29 = vmul.f32 %v1926_v28, %v2079_v14  ;;  %v2231_v55 = vpop.f32.mrb[20].mxu0  ;;  %v580_v22 = vrot.slane %v2079_v14, 7  ;;  %v762_v6 = vrot.slane %v2079_v14, 1 }
 0x16a   :  { %v444_v57 = vsel %vm422_vm1, %v399_v3, %v400_v13  ;;  %v445_v18 = vsel %vm422_vm1, %v398_v10, %v399_v3  ;;  %v2241_v7 = vpop.f32.mrb[21].mxu0  ;;  %1106 = vst [vmem:[#allocation2 + $0x38] sm:$0xff] %v1074_v59  ;;  %v943_v46 = vrot.slane %v2079_v14, 2  ;;  %v584_v2 = vrot.slane %v2138_v23, 7 }
 0x16b   :  { %v715_v12 = vadd.f32 %v683_v9, %v534_v8  ;;  %v500_v48 = vmul.f32 %v1923_v25, %v445_v18  ;;  %v501_v26 = vmul.f32 %v1923_v25, %v444_v57  ;;  %v2246_v21 = vpop.f32.mrb[22].mxu0  ;;  %v625_v13 = vsel %vm603_vm2, %v580_v22, %v581_v53 }
 0x16c   :  { %v626_v10 = vsel %vm603_vm2, %v579_v16, %v580_v22  ;;  %v807_v20 = vsel %vm785_vm3, %v762_v6, %v763_v45  ;;  %v808_v17 = vsel %vm785_vm3, %v761_v5, %v762_v6  ;;  %v2260_v44 = vpop.f32.mrb[23].mxu0  ;;  %v682_v59 = vmul.f32 %v1935_v34, %v625_v13 }
 0x16d   :  { %v532_v14 = vadd.f32 %v500_v48, %v351_v29  ;;  %v533_v63 = vadd.f32 %v501_v26, %v352_v58  ;;  %v681_v3 = vmul.f32 %v1935_v34, %v626_v10  ;;  %v864_v53 = vmul.f32 %v1940_v36, %v806_v62 }
 0x16e   :  { %v862_v16 = vmul.f32 %v1940_v36, %v808_v17  ;;  %v988_v45 = vsel %vm966_vm4, %v943_v46, %v944_v39  ;;  %v989_v5 = vsel %vm966_vm4, %v942_v40, %v943_v46  ;;  %v1045_v8 = vmul.f32 %v1943_v37, %v987_v61 }
 0x16f   :  { %v713_v9 = vadd.f32 %v681_v3, %v532_v14  ;;  %v714_v58 = vadd.f32 %v682_v59, %v533_v63  ;;  %v863_v29 = vmul.f32 %v1940_v36, %v807_v20  ;;  %v1043_v18 = vmul.f32 %v1943_v37, %v989_v5 }
 0x170   :  { %v894_v57 = vadd.f32 %v862_v16, %v712_v33  ;;  %v1044_v62 = vmul.f32 %v1943_v37, %v988_v45  ;;  %v404_v22 = vrot.slane %v2115_v4, 6  ;;  %v585_v39 = vrot.slane %v2115_v4, 7 }
 0x171   :  { %v895_v1 = vadd.f32 %v863_v29, %v713_v9  ;;  %v896_v6 = vadd.f32 %v864_v53, %v714_v58  ;;  %v767_v48 = vrot.slane %v2115_v4, 1  ;;  %v2279_v40 = vpop.f32.mrb[24].mxu0  ;;  %v948_v26 = vrot.slane %v2115_v4, 2 }
 0x172   :  { %v2281_v61 = vadd.f32 %v1043_v18, %v894_v57  ;;  %v402_v33 = vrot.slane %v2121_v52, 6  ;;  %v583_v46 = vrot.slane %v2121_v52, 7  ;;  %v2286_v13 = vpop.f32.mrb[25].mxu0  ;;  %v765_v17 = vrot.slane %v2121_v52, 1 }
 0x173   :  { %v2288_v10 = vadd.f32 %v1044_v62, %v895_v1  ;;  %v2290_v20 = vadd.f32 %v1045_v8, %v896_v6  ;;  %v946_v14 = vrot.slane %v2121_v52, 2  ;;  %v2294_v63 = vpop.f32.mrb[26].mxu0  ;;  %v354_v3 = vmul.f32 %v1926_v28, %v2121_v52 }
 0x174   :  { %v442_v59 = vsel %vm422_vm1, %v401_v32, %v402_v33  ;;  %v623_v53 = vsel %vm603_vm2, %v582_v19, %v583_v46  ;;  %v405_v16 = vrot.slane %v2127_v56, 6  ;;  %v2307_v45 = vpop.f32.mrb[27].mxu0  ;;  %v805_v8 = vsel %vm785_vm3, %v764_v31, %v765_v17 }
 0x175   :  { %v503_v5 = vmul.f32 %v1923_v25, %v442_v59  ;;  %v986_v32 = vsel %vm966_vm4, %v945_v54, %v946_v14  ;;  %v357_v19 = vmul.f32 %v2127_v56, %v1926_v28  ;;  %v684_v9 = vmul.f32 %v1935_v34, %v623_v53 }
 0x176   :  { %v865_v58 = vmul.f32 %v1940_v36, %v805_v8  ;;  %v439_v29 = vsel %vm422_vm1, %v404_v22, %v405_v16  ;;  %v586_v31 = vrot.slane %v2127_v56, 7  ;;  %v2913_v18 = vrot.slane %v2127_v56, 1 }
 0x177   :  { %v535_v57 = vadd.f32 %v503_v5, %v354_v3  ;;  %v506_v11 = vmul.f32 %v1923_v25, %v439_v29  ;;  %v2912_v54 = vrot.slane %v2127_v56, 2  ;;  %v1046_v1 = vmul.f32 %v1943_v37, %v986_v32 }
 0x178   :  { %v897_v62 = vadd.f32 %v865_v58, %v715_v12  ;;  %v620_v6 = vsel %vm603_vm2, %v585_v39, %v586_v31  ;;  %v403_v59 = vrot.slane %v2138_v23, 6  ;;  %v802_v12 = vsel %vm785_vm3, %v767_v48, %v2913_v18 }
 0x179   :  { %v716_v53 = vadd.f32 %v684_v9, %v535_v57  ;;  %v538_v3 = vadd.f32 %v506_v11, %v357_v19  ;;  %v687_v5 = vmul.f32 %v1935_v34, %v620_v6  ;;  %v2347_v8 = vpop.f32.mrb[28].mxu0  ;;  %v356_v32 = vmul.f32 %v2115_v4, %v1926_v28 }
 0x17a   :  { %v2351_v58 = vadd.f32 %v1046_v1, %v897_v62  ;;  %v983_v19 = vsel %vm966_vm4, %v948_v26, %v2912_v54  ;;  %v440_v9 = vsel %vm422_vm1, %v403_v59, %v404_v22  ;;  %v2362_v29 = vpop.f32.mrb[29].mxu0  ;;  %v355_v11 = vmul.f32 %v1926_v28, %v2138_v23 }
 0x17b   :  { %v2364_v57 = vadd.f32 %v687_v5, %v538_v3  ;;  %v441_v62 = vsel %vm422_vm1, %v402_v33, %v403_v59  ;;  %v505_v1 = vmul.f32 %v1923_v25, %v440_v9  ;;  %v2372_v6 = vpop.f32.mrb[30].mxu0  ;;  %v766_v51 = vrot.slane %v2138_v23, 1 }
 0x17c   :  { %v504_v22 = vmul.f32 %v1923_v25, %v441_v62  ;;  %v947_v3 = vrot.slane %v2138_v23, 2  ;;  %1157 = vst [vmem:[#allocation12 - $0x4] sm:$0xc0] %v2372_v6  ;;  %v2381_v33 = vpop.f32.mrb[31].mxu0  ;;  %v868_v59 = vmul.f32 %v1940_v36, %v802_v12  ;;  %v1049_v5 = vmul.f32 %v1943_v37, %v983_v19 }
 0x17d   :  { %v537_v9 = vadd.f32 %v505_v1, %v356_v32  ;;  %v408_v62 = vrot.slane %v2162_v0, 6  ;;  %v621_v23 = vsel %vm603_vm2, %v584_v2, %v585_v39  ;;  %v622_v49 = vsel %vm603_vm2, %v583_v46, %v584_v2 }
 0x17e   :  { %v536_v50 = vadd.f32 %v504_v22, %v355_v11  ;;  %v803_v54 = vsel %vm785_vm3, %v766_v51, %v767_v48  ;;  %v685_v12 = vmul.f32 %v1935_v34, %v622_v49  ;;  %v686_v32 = vmul.f32 %v1935_v34, %v621_v23 }
 0x17f   :  { %v804_v19 = vsel %vm785_vm3, %v765_v17, %v766_v51  ;;  %v589_v11 = vrot.slane %v2162_v0, 7  ;;  %v867_v39 = vmul.f32 %v1940_v36, %v803_v54  ;;  %v984_v2 = vsel %vm966_vm4, %v947_v3, %v948_v26 }
 0x180   :  { %v866_v1 = vmul.f32 %v1940_v36, %v804_v19  ;;  %v985_v49 = vsel %vm966_vm4, %v946_v14, %v947_v3  ;;  %v717_v48 = vadd.f32 %v685_v12, %v536_v50  ;;  %v718_v46 = vadd.f32 %v686_v32, %v537_v9 }
 0x181   :  { %v1047_v51 = vmul.f32 %v1943_v37, %v985_v49  ;;  %v771_v17 = vrot.slane %v2162_v0, 1  ;;  %v1048_v23 = vmul.f32 %v1943_v37, %v984_v2  ;;  %v952_v54 = vrot.slane %v2162_v0, 2 }
 0x182   :  { %v898_v22 = vadd.f32 %v866_v1, %v716_v53  ;;  %v406_v4 = vrot.slane %v2171_v60, 6  ;;  %v899_v19 = vadd.f32 %v867_v39, %v717_v48  ;;  %v900_v26 = vadd.f32 %v868_v59, %v718_v46 }
 0x183   :  { %v587_v52 = vrot.slane %v2171_v60, 7  ;;  %v769_v18 = vrot.slane %v2171_v60, 1  ;;  %v358_v50 = vmul.f32 %v1926_v28, %v2171_v60  ;;  %v950_v3 = vrot.slane %v2171_v60, 2 }
 0x184   :  { %v2418_v14 = vadd.f32 %v1047_v51, %v898_v22  ;;  %v438_v53 = vsel %vm422_vm1, %v405_v16, %v406_v4  ;;  %v2427_v9 = vadd.f32 %v1048_v23, %v899_v19  ;;  %v2429_v12 = vadd.f32 %v1049_v5, %v900_v26 }
 0x185   :  { %v471_v59 = vsel %vm374_vm5, %v438_v53, 0.0  ;;  %v619_v32 = vsel %vm603_vm2, %v586_v31, %v587_v52  ;;  %v2915_v16 = vrot.slane %v2127_v56, 1  ;;  %v2916_v5 = vrot.slane %v2127_v56, 2 }
 0x186   :  { %v507_v1 = vmul.f32 %v1923_v25, %v471_v59  ;;  %v652_v39 = vsel %vm555_vm6, %v619_v32, 0.0  ;;  %v361_v48 = vmul.f32 %v2178_v27, %v1926_v28  ;;  %v2914_v46 = vrot.slane %v2178_v27, 6 }
 0x187   :  { %v801_v60 = vsel %vm785_vm3, %v2915_v16, %v769_v18  ;;  %v982_v2 = vsel %vm966_vm4, %v2916_v5, %v950_v3  ;;  %v688_v22 = vmul.f32 %v1935_v34, %v652_v39  ;;  %v590_v56 = vrot.slane %v2178_v27, 7 }
 0x188   :  { %v833_v49 = vsel %vm752_vm7, %v801_v60, 0.0  ;;  %v1014_v31 = vsel %vm933_vm8, %v982_v2, 0.0  ;;  %v539_v51 = vadd.f32 %v507_v1, %v358_v50  ;;  %v435_v26 = vsel %vm422_vm1, %v408_v62, %v2914_v46 }
 0x189   :  { %v869_v23 = vmul.f32 %v1940_v36, %v833_v49  ;;  %v1050_v19 = vmul.f32 %v1943_v37, %v1014_v31  ;;  %v772_v53 = vrot.slane %v2178_v27, 1  ;;  %v953_v59 = vrot.slane %v2178_v27, 2 }
 0x18a   :  { %v720_v32 = vadd.f32 %v688_v22, %v539_v51  ;;  %v510_v1 = vmul.f32 %v1923_v25, %v435_v26  ;;  %v616_v39 = vsel %vm603_vm2, %v589_v11, %v590_v56  ;;  %v360_v16 = vmul.f32 %v2162_v0, %v1926_v28 }
 0x18b   :  { %v901_v50 = vadd.f32 %v869_v23, %v2364_v57  ;;  %v798_v60 = vsel %vm785_vm3, %v771_v17, %v772_v53  ;;  %v979_v5 = vsel %vm966_vm4, %v952_v54, %v953_v59  ;;  %v407_v2 = vrot.slane %v2191_v24, 6 }
 0x18c   :  { %v542_v31 = vadd.f32 %v510_v1, %v361_v48  ;;  %v691_v57 = vmul.f32 %v1935_v34, %v616_v39  ;;  %v359_v51 = vmul.f32 %v1926_v28, %v2191_v24  ;;  %v588_v23 = vrot.slane %v2191_v24, 7 }
 0x18d   :  { %v2476_v49 = vadd.f32 %v1050_v19, %v901_v50  ;;  %v436_v22 = vsel %vm422_vm1, %v407_v2, %v408_v62  ;;  %v437_v0 = vsel %vm422_vm1, %v406_v4, %v407_v2  ;;  %v770_v26 = vrot.slane %v2191_v24, 1 }
 0x18e   :  { %v723_v46 = vadd.f32 %v691_v57, %v542_v31  ;;  %v508_v19 = vmul.f32 %v1923_v25, %v437_v0  ;;  %v509_v48 = vmul.f32 %v1923_v25, %v436_v22  ;;  %v951_v50 = vrot.slane %v2191_v24, 2 }
 0x18f   :  { %v617_v1 = vsel %vm603_vm2, %v588_v23, %v589_v11  ;;  %v618_v62 = vsel %vm603_vm2, %v587_v52, %v588_v23  ;;  %v799_v4 = vsel %vm785_vm3, %v770_v26, %v771_v17  ;;  %v800_v39 = vsel %vm785_vm3, %v769_v18, %v770_v26 }
 0x190   :  { %v540_v2 = vadd.f32 %v508_v19, %v359_v51  ;;  %v541_v31 = vadd.f32 %v509_v48, %v360_v16  ;;  %v689_v57 = vmul.f32 %v1935_v34, %v618_v62  ;;  %v690_v22 = vmul.f32 %v1935_v34, %v617_v1 }
 0x191   :  { %v872_v24 = vmul.f32 %v1940_v36, %v798_v60  ;;  %v870_v0 = vmul.f32 %v1940_v36, %v800_v39  ;;  %v980_v11 = vsel %vm966_vm4, %v951_v50, %v952_v54  ;;  %v981_v52 = vsel %vm966_vm4, %v950_v3, %v951_v50 }
 0x192   :  { %v1053_v17 = vmul.f32 %v1943_v37, %v979_v5  ;;  %v721_v23 = vadd.f32 %v689_v57, %v540_v2  ;;  %v722_v18 = vadd.f32 %v690_v22, %v541_v31  ;;  %v871_v16 = vmul.f32 %v1940_v36, %v799_v4 }
 0x193   :  { %v902_v51 = vadd.f32 %v870_v0, %v720_v32  ;;  %v1051_v26 = vmul.f32 %v1943_v37, %v981_v52  ;;  %v1052_v19 = vmul.f32 %v1943_v37, %v980_v11  ;;  %v364_v60 = vmul.f32 %v2231_v55, %v1926_v28 }
 0x194   :  { %v903_v48 = vadd.f32 %v871_v16, %v721_v23  ;;  %v904_v1 = vadd.f32 %v872_v24, %v722_v18  ;;  %v412_v54 = vrot.slane %v2231_v55, 6  ;;  %v593_v3 = vrot.slane %v2231_v55, 7 }
 0x195   :  { %v1083_v50 = vadd.f32 %v1051_v26, %v902_v51  ;;  %v775_v5 = vrot.slane %v2231_v55, 1  ;;  %v410_v62 = vrot.slane %v2241_v7, 6  ;;  %v591_v32 = vrot.slane %v2241_v7, 7 }
 0x196   :  { %v2517_v4 = vadd.f32 %v1052_v19, %v903_v48  ;;  %v2519_v39 = vadd.f32 %v1053_v17, %v904_v1  ;;  %v773_v2 = vrot.slane %v2241_v7, 1  ;;  %v954_v31 = vrot.slane %v2241_v7, 2 }
 0x197   :  { %1115 = vst [vmem:[#allocation2 + $0x80] sm:$0xff] %v1083_v50  ;;  %v1154_v57 = vadd.f32 %v1955_v43, %v1083_v50  ;;  %v956_v22 = vrot.slane %v2231_v55, 2  ;;  %v2917_v24 = vrot.slane %v2178_v27, 6  ;;  %v615_v11 = vsel %vm603_vm2, %v590_v56, %v591_v32 }
 0x198   :  { %v362_v52 = vmul.f32 %v1926_v28, %v2241_v7  ;;  %v797_v23 = vsel %vm785_vm3, %v772_v53, %v773_v2  ;;  %v978_v43 = vsel %vm966_vm4, %v953_v59, %v954_v31  ;;  %v692_v27 = vmul.f32 %v1935_v34, %v615_v11 }
 0x199   :  { %v434_v0 = vsel %vm422_vm1, %v2917_v24, %v410_v62  ;;  %1155 = vst [vmem:[#allocation2 + $0x80] sm:$0x3] %v1154_v57  ;;  %v873_v55 = vmul.f32 %v1940_v36, %v797_v23  ;;  %v413_v18 = vrot.slane %v2246_v21, 6  ;;  %v594_v56 = vrot.slane %v2246_v21, 7 }
 0x19a   :  { %v511_v17 = vmul.f32 %v1923_v25, %v434_v0  ;;  %v1054_v7 = vmul.f32 %v1943_v37, %v978_v43  ;;  %v776_v51 = vrot.slane %v2246_v21, 1  ;;  %v957_v26 = vrot.slane %v2246_v21, 2 }
 0x19b   :  { %v905_v53 = vadd.f32 %v873_v55, %v723_v46  ;;  %v431_v59 = vsel %vm422_vm1, %v412_v54, %v413_v18  ;;  %v612_v19 = vsel %vm603_vm2, %v593_v3, %v594_v56  ;;  %v411_v48 = vrot.slane %v2260_v44, 6 }
 0x19c   :  { %v543_v16 = vadd.f32 %v511_v17, %v362_v52  ;;  %v365_v50 = vmul.f32 %v2246_v21, %v1926_v28  ;;  %v514_v57 = vmul.f32 %v1923_v25, %v431_v59  ;;  %v794_v24 = vsel %vm785_vm3, %v775_v5, %v776_v51 }
 0x19d   :  { %v2555_v0 = vadd.f32 %v1054_v7, %v905_v53  ;;  %v975_v46 = vsel %vm966_vm4, %v956_v22, %v957_v26  ;;  %v363_v11 = vmul.f32 %v1926_v28, %v2260_v44  ;;  %v432_v52 = vsel %vm422_vm1, %v411_v48, %v412_v54 }
 0x19e   :  { %v724_v1 = vadd.f32 %v692_v27, %v543_v16  ;;  %v546_v17 = vadd.f32 %v514_v57, %v365_v50  ;;  %v695_v23 = vmul.f32 %v1935_v34, %v612_v19  ;;  %v433_v21 = vsel %vm422_vm1, %v410_v62, %v411_v48 }
 0x19f   :  { %v513_v43 = vmul.f32 %v1923_v25, %v432_v52  ;;  %v512_v27 = vmul.f32 %v1923_v25, %v433_v21  ;;  %v592_v55 = vrot.slane %v2260_v44, 7  ;;  %v774_v16 = vrot.slane %v2260_v44, 1 }
 0x1a0   :  { %v955_v7 = vrot.slane %v2260_v44, 2  ;;  %v727_v53 = vadd.f32 %v695_v23, %v546_v17  ;;  %v876_v59 = vmul.f32 %v1940_v36, %v794_v24  ;;  %v1057_v54 = vmul.f32 %v1943_v37, %v975_v46 }
 0x1a1   :  { %v545_v50 = vadd.f32 %v513_v43, %v364_v60  ;;  %v544_v19 = vadd.f32 %v512_v27, %v363_v11  ;;  %v613_v62 = vsel %vm603_vm2, %v592_v55, %v593_v3  ;;  %v614_v48 = vsel %vm603_vm2, %v591_v32, %v592_v55 }
 0x1a2   :  { %v795_v57 = vsel %vm785_vm3, %v774_v16, %v775_v5  ;;  %v693_v52 = vmul.f32 %v1935_v34, %v614_v48  ;;  %v694_v44 = vmul.f32 %v1935_v34, %v613_v62  ;;  %v796_v24 = vsel %vm785_vm3, %v773_v2, %v774_v16 }
 0x1a3   :  { %v368_v60 = vmul.f32 %v2279_v40, %v1926_v28  ;;  %v874_v46 = vmul.f32 %v1940_v36, %v796_v24  ;;  %v976_v3 = vsel %vm966_vm4, %v955_v7, %v956_v22  ;;  %v977_v32 = vsel %vm966_vm4, %v954_v31, %v955_v7 }
 0x1a4   :  { %v416_v5 = vrot.slane %v2279_v40, 6  ;;  %v725_v11 = vadd.f32 %v693_v52, %v544_v19  ;;  %v726_v17 = vadd.f32 %v694_v44, %v545_v50  ;;  %v875_v23 = vmul.f32 %v1940_v36, %v795_v57 }
 0x1a5   :  { %v597_v21 = vrot.slane %v2279_v40, 7  ;;  %v906_v2 = vadd.f32 %v874_v46, %v724_v1  ;;  %v1055_v43 = vmul.f32 %v1943_v37, %v977_v32  ;;  %v1056_v27 = vmul.f32 %v1943_v37, %v976_v3 }
 0x1a6   :  { %v779_v55 = vrot.slane %v2279_v40, 1  ;;  %v907_v16 = vadd.f32 %v875_v23, %v725_v11  ;;  %v908_v22 = vadd.f32 %v876_v59, %v726_v17  ;;  %v414_v62 = vrot.slane %v2286_v13, 6 }
 0x1a7   :  { %v595_v31 = vrot.slane %v2286_v13, 7  ;;  %v2598_v7 = vadd.f32 %v1055_v43, %v906_v2  ;;  %v960_v50 = vrot.slane %v2279_v40, 2  ;;  %v777_v19 = vrot.slane %v2286_v13, 1 }
 0x1a8   :  { %v958_v1 = vrot.slane %v2286_v13, 2  ;;  %v2603_v48 = vadd.f32 %v1056_v27, %v907_v16  ;;  %v2605_v57 = vadd.f32 %v1057_v54, %v908_v22  ;;  %v430_v52 = vsel %vm422_vm1, %v413_v18, %v414_v62 }
 0x1a9   :  { %v611_v59 = vsel %vm603_vm2, %v594_v56, %v595_v31  ;;  %v366_v44 = vmul.f32 %v1926_v28, %v2286_v13  ;;  %v515_v24 = vmul.f32 %v1923_v25, %v430_v52  ;;  %v793_v40 = vsel %vm785_vm3, %v776_v51, %v777_v19 }
 0x1aa   :  { %v974_v46 = vsel %vm966_vm4, %v957_v26, %v958_v1  ;;  %v696_v54 = vmul.f32 %v1935_v34, %v611_v59  ;;  %v877_v3 = vmul.f32 %v1940_v36, %v793_v40  ;;  %v417_v18 = vrot.slane %v2294_v63, 6 }
 0x1ab   :  { %v598_v32 = vrot.slane %v2294_v63, 7  ;;  %v547_v56 = vadd.f32 %v515_v24, %v366_v44  ;;  %v1058_v11 = vmul.f32 %v1943_v37, %v974_v46  ;;  %v780_v13 = vrot.slane %v2294_v63, 1 }
 0x1ac   :  { %v961_v17 = vrot.slane %v2294_v63, 2  ;;  %v909_v23 = vadd.f32 %v877_v3, %v727_v53  ;;  %v427_v51 = vsel %vm422_vm1, %v416_v5, %v417_v18  ;;  %v415_v2 = vrot.slane %v2307_v45, 6 }
 0x1ad   :  { %v608_v26 = vsel %vm603_vm2, %v597_v21, %v598_v32  ;;  %v728_v43 = vadd.f32 %v696_v54, %v547_v56  ;;  %v369_v27 = vmul.f32 %v2294_v63, %v1926_v28  ;;  %v518_v16 = vmul.f32 %v1923_v25, %v427_v51 }
 0x1ae   :  { %v790_v22 = vsel %vm785_vm3, %v779_v55, %v780_v13  ;;  %v2635_v52 = vadd.f32 %v1058_v11, %v909_v23  ;;  %v971_v53 = vsel %vm966_vm4, %v960_v50, %v961_v17  ;;  %v367_v59 = vmul.f32 %v1926_v28, %v2307_v45 }
 0x1af   :  { %v428_v44 = vsel %vm422_vm1, %v415_v2, %v416_v5  ;;  %v550_v24 = vadd.f32 %v518_v16, %v369_v27  ;;  %v699_v40 = vmul.f32 %v1935_v34, %v608_v26  ;;  %v429_v63 = vsel %vm422_vm1, %v414_v62, %v415_v2 }
 0x1b0   :  { %v517_v46 = vmul.f32 %v1923_v25, %v428_v44  ;;  %v516_v54 = vmul.f32 %v1923_v25, %v429_v63  ;;  %v596_v3 = vrot.slane %v2307_v45, 7  ;;  %v778_v56 = vrot.slane %v2307_v45, 1 }
 0x1b1   :  { %v959_v11 = vrot.slane %v2307_v45, 2  ;;  %v731_v23 = vadd.f32 %v699_v40, %v550_v24  ;;  %v880_v51 = vmul.f32 %v1940_v36, %v790_v22  ;;  %v1061_v5 = vmul.f32 %v1943_v37, %v971_v53 }
 0x1b2   :  { %v549_v27 = vadd.f32 %v517_v46, %v368_v60  ;;  %v548_v26 = vadd.f32 %v516_v54, %v367_v59  ;;  %v609_v62 = vsel %vm603_vm2, %v596_v3, %v597_v21  ;;  %v610_v2 = vsel %vm603_vm2, %v595_v31, %v596_v3 }
 0x1b3   :  { %v791_v16 = vsel %vm785_vm3, %v778_v56, %v779_v55  ;;  %v697_v44 = vmul.f32 %v1935_v34, %v610_v2  ;;  %v698_v45 = vmul.f32 %v1935_v34, %v609_v62  ;;  %v792_v22 = vsel %vm785_vm3, %v777_v19, %v778_v56 }
 0x1b4   :  { %v420_v53 = vrot.slane %v2347_v8, 6  ;;  %v878_v60 = vmul.f32 %v1940_v36, %v792_v22  ;;  %v879_v59 = vmul.f32 %v1940_v36, %v791_v16  ;;  %v972_v21 = vsel %vm966_vm4, %v959_v11, %v960_v50 }
 0x1b5   :  { %v973_v31 = vsel %vm966_vm4, %v958_v1, %v959_v11  ;;  %v729_v55 = vadd.f32 %v697_v44, %v548_v26  ;;  %v730_v24 = vadd.f32 %v698_v45, %v549_v27  ;;  %v601_v63 = vrot.slane %v2347_v8, 7 }
 0x1b6   :  { %v1059_v40 = vmul.f32 %v1943_v37, %v973_v31  ;;  %v910_v46 = vadd.f32 %v878_v60, %v728_v43  ;;  %v1060_v19 = vmul.f32 %v1943_v37, %v972_v21  ;;  %v783_v54 = vrot.slane %v2347_v8, 1 }
 0x1b7   :  { %v964_v3 = vrot.slane %v2347_v8, 2  ;;  %v911_v56 = vadd.f32 %v879_v59, %v729_v55  ;;  %v912_v62 = vadd.f32 %v880_v51, %v730_v24  ;;  %v418_v50 = vrot.slane %v2362_v29, 6 }
 0x1b8   :  { %v599_v2 = vrot.slane %v2362_v29, 7  ;;  %v2677_v1 = vadd.f32 %v1059_v40, %v910_v46  ;;  %v370_v11 = vmul.f32 %v1926_v28, %v2362_v29  ;;  %v781_v27 = vrot.slane %v2362_v29, 1 }
 0x1b9   :  { %v962_v43 = vrot.slane %v2362_v29, 2  ;;  %v2683_v26 = vadd.f32 %v1060_v19, %v911_v56  ;;  %v2685_v16 = vadd.f32 %v1061_v5, %v912_v62  ;;  %v426_v51 = vsel %vm422_vm1, %v417_v18, %v418_v50 }
 0x1ba   :  { %v607_v44 = vsel %vm603_vm2, %v598_v32, %v599_v2  ;;  %v519_v45 = vmul.f32 %v1923_v25, %v426_v51  ;;  %v789_v22 = vsel %vm785_vm3, %v780_v13, %v781_v27  ;;  %v373_v5 = vmul.f32 %v2372_v6, %v1926_v28 }
 0x1bb   :  { %v970_v60 = vsel %vm966_vm4, %v961_v17, %v962_v43  ;;  %v700_v18 = vmul.f32 %v1935_v34, %v607_v44  ;;  %v881_v59 = vmul.f32 %v1940_v36, %v789_v22  ;;  %v421_v32 = vrot.slane %v2372_v6, 6 }
 0x1bc   :  { %v602_v21 = vrot.slane %v2372_v6, 7  ;;  %v551_v31 = vadd.f32 %v519_v45, %v370_v11  ;;  %v1062_v55 = vmul.f32 %v1943_v37, %v970_v60  ;;  %v784_v13 = vrot.slane %v2372_v6, 1 }
 0x1bd   :  { %v965_v24 = vrot.slane %v2372_v6, 2  ;;  %v913_v40 = vadd.f32 %v881_v59, %v731_v23  ;;  %v423_v17 = vsel %vm422_vm1, %v420_v53, %v421_v32  ;;  %v2918_v46 = vrot.slane %v1951_v41, 6 }
 0x1be   :  { %v604_v56 = vsel %vm603_vm2, %v601_v63, %v602_v21  ;;  %v732_v62 = vadd.f32 %v700_v18, %v551_v31  ;;  %v522_v23 = vmul.f32 %v1923_v25, %v423_v17  ;;  %v2919_v11 = vrot.slane %v1951_v41, 7 }
 0x1bf   :  { %v454_v19 = vsel %vm422_vm1, %v421_v32, %v2918_v46  ;;  %v2728_v44 = vadd.f32 %v1062_v55, %v913_v40  ;;  %v703_v60 = vmul.f32 %v1935_v34, %v604_v56  ;;  %v786_v32 = vsel %vm785_vm3, %v783_v54, %v784_v13 }
 0x1c0   :  { %v455_v6 = vsel %vm374_vm5, %v454_v19, 0.0  ;;  %v635_v51 = vsel %vm603_vm2, %v602_v21, %v2919_v11  ;;  %v554_v18 = vadd.f32 %v522_v23, %v373_v5  ;;  %v2920_v31 = vrot.slane %v1951_v41, 1 }
 0x1c1   :  { %v491_v45 = vmul.f32 %v1923_v25, %v455_v6  ;;  %v636_v22 = vsel %vm555_vm6, %v635_v51, 0.0  ;;  %v967_v5 = vsel %vm966_vm4, %v964_v3, %v965_v24  ;;  %v2921_v17 = vrot.slane %v1951_v41, 2 }
 0x1c2   :  { %v672_v59 = vmul.f32 %v1935_v34, %v636_v22  ;;  %v817_v21 = vsel %vm785_vm3, %v784_v13, %v2920_v31  ;;  %v372_v19 = vmul.f32 %v2347_v8, %v1926_v28  ;;  %v735_v56 = vadd.f32 %v703_v60, %v554_v18 }
 0x1c3   :  { %v523_v55 = vadd.f32 %v491_v45, %v1962_v47  ;;  %v849_v40 = vsel %vm752_vm7, %v817_v21, 0.0  ;;  %v998_v46 = vsel %vm966_vm4, %v965_v24, %v2921_v17  ;;  %v371_v23 = vmul.f32 %v1926_v28, %v2381_v33 }
 0x1c4   :  { %v885_v13 = vmul.f32 %v1940_v36, %v849_v40  ;;  %v1030_v47 = vsel %vm933_vm8, %v998_v46, 0.0  ;;  %v419_v11 = vrot.slane %v2381_v33, 6  ;;  %v600_v41 = vrot.slane %v2381_v33, 7  ;;  %v1212_v46 = vld [vmem:[#allocation9 + $0x30] sm:$0xff] }
 0x1c5   :  { %v704_v6 = vadd.f32 %v672_v59, %v523_v55  ;;  %v1066_v24 = vmul.f32 %v1943_v37, %v1030_v47  ;;  %v782_v45 = vrot.slane %v2381_v33, 1  ;;  %v963_v22 = vrot.slane %v2381_v33, 2  ;;  %v1210_v55 = vld [vmem:[#allocation9 + $0x20] sm:$0xff] }
 0x1c6   :  { %v917_v51 = vadd.f32 %v885_v13, %v735_v56  ;;  %v424_v38 = vsel %vm422_vm1, %v419_v11, %v420_v53  ;;  %v425_v28 = vsel %vm422_vm1, %v418_v50, %v419_v11  ;;  %v605_v18 = vsel %vm603_vm2, %v600_v41, %v601_v63 }
 0x1c7   :  { %v886_v60 = vadd.f32 %v2024_v30, %v704_v6  ;;  %v520_v31 = vmul.f32 %v1923_v25, %v425_v28  ;;  %v521_v33 = vmul.f32 %v1923_v25, %v424_v38  ;;  %v606_v30 = vsel %vm603_vm2, %v599_v2, %v600_v41  ;;  %v1211_v2 = vld [vmem:[#allocation9 + $0x28] sm:$0xff] }
 0x1c8   :  { %v2777_v59 = vadd.f32 %v1066_v24, %v917_v51  ;;  %v701_v53 = vmul.f32 %v1935_v34, %v606_v30  ;;  %v787_v50 = vsel %vm785_vm3, %v782_v45, %v783_v54  ;;  %v702_v17 = vmul.f32 %v1935_v34, %v605_v18  ;;  %v1159_v30 = vld [vmem:[#allocation2 + $0x8] sm:$0xff] }
 0x1c9   :  { %v1067_v21 = vadd.f32 %v2098_v35, %v886_v60  ;;  %v552_v63 = vadd.f32 %v520_v31, %v371_v23  ;;  %v553_v40 = vadd.f32 %v521_v33, %v372_v19  ;;  %v788_v25 = vsel %vm785_vm3, %v781_v27, %v782_v45  ;;  %v1213_v35 = vld [vmem:[#allocation9 + $0x38] sm:$0xff] }
 0x1ca   :  { %v882_v13 = vmul.f32 %v1940_v36, %v788_v25  ;;  %v968_v54 = vsel %vm966_vm4, %v963_v22, %v964_v3  ;;  %v969_v34 = vsel %vm966_vm4, %v962_v43, %v963_v22  ;;  %v883_v47 = vmul.f32 %v1940_v36, %v787_v50  ;;  %v1215_v43 = vld [vmem:[#allocation9 + $0x48] sm:$0xff] }
 0x1cb   :  { %1099 = vst [vmem:[#allocation2] sm:$0xff] %v1067_v21  ;;  %v1141_v56 = vadd.f32 %v1953_v42, %v1067_v21  ;;  %v733_v19 = vadd.f32 %v701_v53, %v552_v63  ;;  %v734_v27 = vadd.f32 %v702_v17, %v553_v40  ;;  %v884_v6 = vmul.f32 %v1940_v36, %v786_v32  ;;  %v1217_v32 = vld [vmem:[#allocation9 + $0x58] sm:$0xff]  ;;  %v1164_v63 = vld [vmem:[#allocation2 + $0x30] sm:$0xff] }
 0x1cc   :  { %v914_v42 = vadd.f32 %v882_v13, %v732_v62  ;;  %v1063_v23 = vmul.f32 %v1943_v37, %v969_v34  ;;  %v1224_v11 = vpack.c.bf16 %v1211_v2, %v1210_v55  ;;  %v1225_v8 = vpack.c.bf16 %v1213_v35, %v1212_v46  ;;  %v1216_v62 = vld [vmem:[#allocation9 + $0x50] sm:$0xff]  ;;  %v1162_v53 = vld [vmem:[#allocation2 + $0x20] sm:$0xff] }
 0x1cd   :  { %1142 = vst [vmem:[#allocation2] sm:$0x3] %v1141_v56  ;;  %v1065_v41 = vmul.f32 %v1943_v37, %v967_v5  ;;  %v915_v3 = vadd.f32 %v883_v47, %v733_v19  ;;  %v916_v51 = vadd.f32 %v884_v6, %v734_v27  ;;  %v1064_v29 = vmul.f32 %v1943_v37, %v968_v54  ;;  %v1165_v55 = vld [vmem:[#allocation2 + $0x38] sm:$0xff]  ;;  %v1174_v46 = vld [vmem:[#allocation2 + $0x80] sm:$0xff] }
 0x1ce   :  { %v2809_v24 = vadd.f32 %v1063_v23, %v914_v42  ;;  %1598 = vmatprep.subr.bf16.mxu1 %v1224_v11  ;;  %v1226_v36 = vpack.c.bf16 %v1215_v43, %v1214_v15  ;;  %v1199_v60 = vpack.c.bf16 %v2555_v0, %v2519_v39  ;;  %v1200_v5 = vpack.c.bf16 %v2603_v48, %v2598_v7  ;;  %v1218_v7 = vld [vmem:[#allocation9 + $0x60] sm:$0xff]  ;;  %v1219_v48 = vld [vmem:[#allocation9 + $0x68] sm:$0xff] }
 0x1cf   :  { %v1096_v45 = vadd.f32 %v1064_v29, %v915_v3  ;;  %v1097_v22 = vadd.f32 %v1065_v41, %v916_v51  ;;  %1599 = vmatpush3.bf16.msra.mxu1 %v1224_v11  ;;  %v1201_v37 = vpack.c.bf16 %v2635_v52, %v2605_v57  ;;  %v1202_v38 = vpack.c.bf16 %v2683_v26, %v2677_v1  ;;  %v1220_v52 = vld [vmem:[#allocation9 + $0x70] sm:$0xff]  ;;  %v1221_v1 = vld [vmem:[#allocation9 + $0x78] sm:$0xff] }
 0x1d0   :  { %1600 = vmatprep.subr.bf16.mxu1 %v1225_v8  ;;  %v1203_v28 = vpack.c.bf16 %v2728_v44, %v2685_v16  ;;  %v1227_v39 = vpack.c.bf16 %v1217_v32, %v1216_v62  ;;  %v1228_v57 = vpack.c.bf16 %v1219_v48, %v1218_v7  ;;  %v1229_v26 = vpack.c.bf16 %v1221_v1, %v1220_v52  ;;  %v1161_v16 = vld [vmem:[#allocation2 + $0x18] sm:$0xff]  ;;  %v1163_v44 = vld [vmem:[#allocation2 + $0x28] sm:$0xff] }
 0x1d1   :  { %v1204_v18 = vpack.c.bf16 %v1096_v45, %v2809_v24  ;;  %v1205_v31 = vpack.c.bf16 %v2777_v59, %v1097_v22  ;;  %v1160_v59 = vld [vmem:[#allocation2 + $0x10] sm:$0xff]  ;;  %v1192_v50 = vpack.c.bf16 %v1163_v44, %v1162_v53  ;;  %v1193_v40 = vpack.c.bf16 %v1165_v55, %v1164_v63 }
 0x1d2   :  { %v1191_v21 = vpack.c.bf16 %v1161_v16, %v1160_v59  ;;  %v1194_v17 = vpack.c.bf16 %v2288_v10, %v2281_v61  ;;  %v1195_v25 = vpack.c.bf16 %v2351_v58, %v2290_v20  ;;  %v1196_v2 = vpack.c.bf16 %v2427_v9, %v2418_v14 }
 0x1d3   :  { %1601 = vmatpush3.bf16.msra.mxu1 %v1225_v8  ;;  %v1197_v35 = vpack.c.bf16 %v2476_v49, %v2429_v12  ;;  %v1198_v56 = vpack.c.bf16 %v2517_v4, %v1174_v46 }
 0x1d4   :  { %v1158_v33 = vld [vmem:[#allocation2] sm:$0xff]  ;;  %1602 = vmatprep.subr.bf16.mxu1 %v1226_v36 }
 0x1d5   :  { %v1190_v0 = vpack.c.bf16 %v1159_v30, %v1158_v33 }
 0x1d7   :  { %1610 = vmatprep.mubr.bf16.mxu1 %v1190_v0  ;;  %1603 = vmatpush3.bf16.msra.mxu1 %v1226_v36 }
 0x1d8   :  { %1604 = vmatprep.subr.bf16.mxu1 %v1227_v39 }
 0x1db   :  { %1605 = vmatpush3.bf16.msra.mxu1 %v1227_v39 }
 0x1dc   :  { %1606 = vmatprep.subr.bf16.mxu1 %v1228_v57 }
 0x1df   :  { %1607 = vmatpush3.bf16.msra.mxu1 %v1228_v57 }
 0x1e0   :  { %1608 = vmatprep.subr.bf16.mxu1 %v1229_v26 }
 0x1e3   :  { %1609 = vmatpush3.bf16.msra.mxu1 %v1229_v26 }
 0x1e6   :  { %1611 = vmatmul.mubr.bf16.vlgmr.msra.gmra.mrb[0].mxu1 %v1191_v21 }
 0x1e7   :  { %1614 = vmatprep.mubr.bf16.mxu1 %v1192_v50 }
 0x1ee   :  { %1615 = vmatmul.mubr.bf16.gmra.mrb[4].mxu1 %v1193_v40 }
 0x1ef   :  { %1618 = vmatprep.mubr.bf16.mxu1 %v1194_v17 }
 0x1f6   :  { %1619 = vmatmul.mubr.bf16.gmra.mrb[8].mxu1 %v1195_v25 }
 0x1f7   :  { %1622 = vmatprep.mubr.bf16.mxu1 %v1196_v2 }
 0x1fe   :  { %1623 = vmatmul.mubr.bf16.gmra.mrb[12].mxu1 %v1197_v35 }
 0x1ff   :  { %1626 = vmatprep.mubr.bf16.mxu1 %v1198_v56 }
 0x206   :  { %1627 = vmatmul.mubr.bf16.gmra.mrb[16].mxu1 %v1199_v60 }
 0x207   :  { %1630 = vmatprep.mubr.bf16.mxu1 %v1200_v5 }
 0x20e   :  { %1631 = vmatmul.mubr.bf16.gmra.mrb[20].mxu1 %v1201_v37 }
 0x20f   :  { %1634 = vmatprep.mubr.bf16.mxu1 %v1202_v38 }
 0x216   :  { %1635 = vmatmul.mubr.bf16.gmra.mrb[24].mxu1 %v1203_v28 }
 0x217   :  { %1638 = vmatprep.mubr.bf16.mxu1 %v1204_v18 }
 0x21e   :  { %1639 = vmatmul.mubr.bf16.gmra.mrb[28].mxu1 %v1205_v31 }
 0x21f   :  { %1751 = shalt.err (!%p1748_p8)
}
 0x220   :  { %s1752_s22 = scalar_lea.hbm %s2907_s8, 64 }
 0x221   :  { %p1753_p9 = scmp.ne.s32.totalorder %s2907_s8, %s1752_s22  ;;  %p1756_p10 = scmp.lt.u32.totalorder %s1752_s22, %s2907_s8 }
 0x223   :  { %p1758_p11 = pnand %p1756_p10, %p1753_p9 }
 0x225   :  { %1761 = shalt.err (!%p1758_p11)
}
 0x226   :  { %1485 = dma.vmem_to_hbm [thread:$0]  %s1480_s17, 64, %s2907_s8, [#allocation13], %s1795_s15, %s1795_s15, %s1796_s16  }
 0x227   :  { %v2850_v61 = vld [vmem:[%s2905_s6] ss:$0 sm:$0xff]  ;;  %s1803_s6 = smov [#allocation11]  }
 0x228   :  { %s1467_s8 = sshll.u32 %s1803_s6, 4  ;;  %s1468_s8 = int_to_ptr.vmem [resolvable:$true] %s1467_s8 }
 0x229   :  { %s1762_s15 = scalar_lea.vmem %s1468_s8, 4096  ;;  %p1767_p13 = scmp.lt.s32.totalorder %s1468_s8, %s1468_s8 }
 0x22a   :  { %p1763_p12 = scmp.ne.s32.totalorder %s1468_s8, %s1762_s15  ;;  %p1768_p0 = scmp.lt.s32.totalorder %s1762_s15, %s1762_s15 }
 0x22c   :  { %p1769_p1 = por %p1768_p0, %p1767_p13 }
 0x22e   :  { %p1770_p2 = pnand %p1769_p1, %p1763_p12 }
 0x2b9   :  { %v1612_v10 = vpop.f32.mrb[0].mxu1 }
 0x2ba   :  { %v1280_v20 = vadd.f32 %v1612_v10, %v2850_v61  ;;  %v1271_v58 = vpop.f32.mrb[1].mxu1 }
 0x2bb   :  { %v1272_v14 = vadd.f32 %v2850_v61, %v1271_v58  ;;  %v1613_v9 = vpop.f32.mrb[2].mxu1 }
 0x2bc   :  { %v1400_v12 = vmax.f32 %v1280_v20, 0.0  ;;  %v1283_v49 = vadd.f32 %v1613_v9, %v2850_v61  ;;  %v1274_v4 = vpop.f32.mrb[3].mxu1 }
 0x2bd   :  { %v1398_v13 = vmax.f32 %v1272_v14, 0.0  ;;  %v1275_v54 = vadd.f32 %v2850_v61, %v1274_v4 }
 0x2be   :  { %1432 = vst [vmem:[#allocation11 + $0x10] sm:$0xff] %v1400_v12  ;;  %v1401_v34 = vmax.f32 %v1283_v49, 0.0 }
 0x2bf   :  { %1430 = vst [vmem:[#allocation11] sm:$0xff] %v1398_v13  ;;  %v1399_v19 = vmax.f32 %v1275_v54, 0.0 }
 0x2c0   :  { %1433 = vst [vmem:[#allocation11 + $0x18] sm:$0xff] %v1401_v34 }
 0x2c1   :  { %1431 = vst [vmem:[#allocation11 + $0x8] sm:$0xff] %v1399_v19  ;;  %v1616_v27 = vpop.f32.mrb[4].mxu1 }
 0x2c2   :  { %v1296_v47 = vadd.f32 %v1616_v27, %v2850_v61  ;;  %v1287_v6 = vpop.f32.mrb[5].mxu1 }
 0x2c3   :  { %v1288_v42 = vadd.f32 %v2850_v61, %v1287_v6  ;;  %v1617_v23 = vpop.f32.mrb[6].mxu1 }
 0x2c4   :  { %v1404_v11 = vmax.f32 %v1296_v47, 0.0  ;;  %v1299_v8 = vadd.f32 %v1617_v23, %v2850_v61  ;;  %v1290_v41 = vpop.f32.mrb[7].mxu1 }
 0x2c5   :  { %v1402_v3 = vmax.f32 %v1288_v42, 0.0  ;;  %v1291_v51 = vadd.f32 %v2850_v61, %v1290_v41 }
 0x2c6   :  { %1436 = vst [vmem:[#allocation11 + $0x30] sm:$0xff] %v1404_v11  ;;  %v1405_v29 = vmax.f32 %v1299_v8, 0.0 }
 0x2c7   :  { %1434 = vst [vmem:[#allocation11 + $0x20] sm:$0xff] %v1402_v3  ;;  %v1403_v15 = vmax.f32 %v1291_v51, 0.0 }
 0x2c8   :  { %1437 = vst [vmem:[#allocation11 + $0x38] sm:$0xff] %v1405_v29 }
 0x2c9   :  { %1435 = vst [vmem:[#allocation11 + $0x28] sm:$0xff] %v1403_v15  ;;  %v1620_v43 = vpop.f32.mrb[8].mxu1 }
 0x2ca   :  { %v1312_v24 = vadd.f32 %v1620_v43, %v2850_v61  ;;  %v1303_v45 = vpop.f32.mrb[9].mxu1 }
 0x2cb   :  { %v1304_v22 = vadd.f32 %v2850_v61, %v1303_v45  ;;  %v1621_v36 = vpop.f32.mrb[10].mxu1 }
 0x2cc   :  { %v1408_v62 = vmax.f32 %v1312_v24, 0.0  ;;  %v1315_v32 = vadd.f32 %v1621_v36, %v2850_v61  ;;  %v1306_v60 = vpop.f32.mrb[11].mxu1 }
 0x2cd   :  { %v1406_v5 = vmax.f32 %v1304_v22, 0.0  ;;  %v1307_v37 = vadd.f32 %v2850_v61, %v1306_v60 }
 0x2ce   :  { %1440 = vst [vmem:[#allocation11 + $0x50] sm:$0xff] %v1408_v62  ;;  %v1409_v38 = vmax.f32 %v1315_v32, 0.0 }
 0x2cf   :  { %1438 = vst [vmem:[#allocation11 + $0x40] sm:$0xff] %v1406_v5  ;;  %v1407_v28 = vmax.f32 %v1307_v37, 0.0 }
 0x2d0   :  { %1441 = vst [vmem:[#allocation11 + $0x58] sm:$0xff] %v1409_v38 }
 0x2d1   :  { %1439 = vst [vmem:[#allocation11 + $0x48] sm:$0xff] %v1407_v28  ;;  %v1624_v18 = vpop.f32.mrb[12].mxu1 }
 0x2d2   :  { %v1328_v31 = vadd.f32 %v1624_v18, %v2850_v61  ;;  %v1319_v33 = vpop.f32.mrb[13].mxu1 }
 0x2d3   :  { %v1320_v30 = vadd.f32 %v2850_v61, %v1319_v33  ;;  %v1625_v39 = vpop.f32.mrb[14].mxu1 }
 0x2d4   :  { %v1412_v0 = vmax.f32 %v1328_v31, 0.0  ;;  %v1331_v7 = vadd.f32 %v1625_v39, %v2850_v61  ;;  %v1322_v48 = vpop.f32.mrb[15].mxu1 }
 0x2d5   :  { %v1410_v57 = vmax.f32 %v1320_v30, 0.0  ;;  %v1323_v52 = vadd.f32 %v2850_v61, %v1322_v48 }
 0x2d6   :  { %1444 = vst [vmem:[#allocation11 + $0x70] sm:$0xff] %v1412_v0  ;;  %v1413_v1 = vmax.f32 %v1331_v7, 0.0 }
 0x2d7   :  { %1442 = vst [vmem:[#allocation11 + $0x60] sm:$0xff] %v1410_v57  ;;  %v1411_v26 = vmax.f32 %v1323_v52, 0.0 }
 0x2d8   :  { %1445 = vst [vmem:[#allocation11 + $0x78] sm:$0xff] %v1413_v1 }
 0x2d9   :  { %1443 = vst [vmem:[#allocation11 + $0x68] sm:$0xff] %v1411_v26  ;;  %v1628_v16 = vpop.f32.mrb[16].mxu1 }
 0x2da   :  { %v1344_v44 = vadd.f32 %v1628_v16, %v2850_v61  ;;  %v1335_v59 = vpop.f32.mrb[17].mxu1 }
 0x2db   :  { %v1336_v21 = vadd.f32 %v2850_v61, %v1335_v59  ;;  %v1629_v53 = vpop.f32.mrb[18].mxu1 }
 0x2dc   :  { %v1416_v50 = vmax.f32 %v1344_v44, 0.0  ;;  %v1347_v55 = vadd.f32 %v1629_v53, %v2850_v61  ;;  %v1338_v63 = vpop.f32.mrb[19].mxu1 }
 0x2dd   :  { %v1414_v40 = vmax.f32 %v1336_v21, 0.0  ;;  %v1339_v17 = vadd.f32 %v2850_v61, %v1338_v63 }
 0x2de   :  { %1448 = vst [vmem:[#allocation11 + $0x90] sm:$0xff] %v1416_v50  ;;  %v1417_v25 = vmax.f32 %v1347_v55, 0.0 }
 0x2df   :  { %1446 = vst [vmem:[#allocation11 + $0x80] sm:$0xff] %v1414_v40  ;;  %v1415_v2 = vmax.f32 %v1339_v17, 0.0 }
 0x2e0   :  { %1449 = vst [vmem:[#allocation11 + $0x98] sm:$0xff] %v1417_v25 }
 0x2e1   :  { %1447 = vst [vmem:[#allocation11 + $0x88] sm:$0xff] %v1415_v2  ;;  %v1632_v46 = vpop.f32.mrb[20].mxu1 }
 0x2e2   :  { %v1360_v35 = vadd.f32 %v1632_v46, %v2850_v61  ;;  %v1351_v56 = vpop.f32.mrb[21].mxu1 }
 0x2e3   :  { %v1352_v10 = vadd.f32 %v2850_v61, %v1351_v56  ;;  %v1633_v20 = vpop.f32.mrb[22].mxu1 }
 0x2e4   :  { %v1420_v58 = vmax.f32 %v1360_v35, 0.0  ;;  %v1363_v14 = vadd.f32 %v1633_v20, %v2850_v61  ;;  %v1354_v9 = vpop.f32.mrb[23].mxu1 }
 0x2e5   :  { %v1418_v12 = vmax.f32 %v1352_v10, 0.0  ;;  %v1355_v49 = vadd.f32 %v2850_v61, %v1354_v9 }
 0x2e6   :  { %1452 = vst [vmem:[#allocation11 + $0xb0] sm:$0xff] %v1420_v58  ;;  %v1421_v4 = vmax.f32 %v1363_v14, 0.0 }
 0x2e7   :  { %1450 = vst [vmem:[#allocation11 + $0xa0] sm:$0xff] %v1418_v12  ;;  %v1419_v13 = vmax.f32 %v1355_v49, 0.0 }
 0x2e8   :  { %1453 = vst [vmem:[#allocation11 + $0xb8] sm:$0xff] %v1421_v4 }
 0x2e9   :  { %1451 = vst [vmem:[#allocation11 + $0xa8] sm:$0xff] %v1419_v13  ;;  %v1636_v54 = vpop.f32.mrb[24].mxu1 }
 0x2ea   :  { %v1376_v34 = vadd.f32 %v1636_v54, %v2850_v61  ;;  %v1367_v19 = vpop.f32.mrb[25].mxu1 }
 0x2eb   :  { %v1368_v27 = vadd.f32 %v2850_v61, %v1367_v19  ;;  %v1637_v47 = vpop.f32.mrb[26].mxu1 }
 0x2ec   :  { %v1424_v6 = vmax.f32 %v1376_v34, 0.0  ;;  %v1379_v42 = vadd.f32 %v1637_v47, %v2850_v61  ;;  %v1370_v23 = vpop.f32.mrb[27].mxu1 }
 0x2ed   :  { %v1422_v11 = vmax.f32 %v1368_v27, 0.0  ;;  %v1371_v8 = vadd.f32 %v2850_v61, %v1370_v23 }
 0x2ee   :  { %1456 = vst [vmem:[#allocation11 + $0xd0] sm:$0xff] %v1424_v6  ;;  %v1425_v41 = vmax.f32 %v1379_v42, 0.0 }
 0x2ef   :  { %1454 = vst [vmem:[#allocation11 + $0xc0] sm:$0xff] %v1422_v11  ;;  %v1423_v3 = vmax.f32 %v1371_v8, 0.0 }
 0x2f0   :  { %1457 = vst [vmem:[#allocation11 + $0xd8] sm:$0xff] %v1425_v41 }
 0x2f1   :  { %1455 = vst [vmem:[#allocation11 + $0xc8] sm:$0xff] %v1423_v3  ;;  %v1640_v51 = vpop.f32.mrb[28].mxu1 }
 0x2f2   :  { %v1392_v29 = vadd.f32 %v1640_v51, %v2850_v61  ;;  %v1383_v15 = vpop.f32.mrb[29].mxu1 }
 0x2f3   :  { %v1384_v43 = vadd.f32 %v2850_v61, %v1383_v15  ;;  %v1641_v24 = vpop.f32.mrb[30].mxu1 }
 0x2f4   :  { %v1428_v45 = vmax.f32 %v1392_v29, 0.0  ;;  %v1395_v22 = vadd.f32 %v1641_v24, %v2850_v61  ;;  %v1386_v36 = vpop.f32.mrb[31].mxu1 }
 0x2f5   :  { %v1426_v62 = vmax.f32 %v1384_v43, 0.0  ;;  %v1387_v32 = vadd.f32 %v2850_v61, %v1386_v36 }
 0x2f6   :  { %1460 = vst [vmem:[#allocation11 + $0xf0] sm:$0xff] %v1428_v45  ;;  %v1429_v60 = vmax.f32 %v1395_v22, 0.0 }
 0x2f7   :  { %1458 = vst [vmem:[#allocation11 + $0xe0] sm:$0xff] %v1426_v62  ;;  %v1427_v5 = vmax.f32 %v1387_v32, 0.0 }
 0x2f8   :  { %1461 = vst [vmem:[#allocation11 + $0xf8] sm:$0xff] %v1429_v60 }
 0x2f9   :  { %1459 = vst [vmem:[#allocation11 + $0xe8] sm:$0xff] %v1427_v5 }
 0x2fa   :  { %1773 = shalt.err (!%p1770_p2)
}
 0x2fb   :  { %s1774_s9 = scalar_lea.hbm %s2906_s7, 4096 }
 0x2fc   :  { %p1775_p3 = scmp.ne.s32.totalorder %s2906_s7, %s1774_s9  ;;  %p1778_p4 = scmp.lt.u32.totalorder %s1774_s9, %s2906_s7 }
 0x2fe   :  { %p1780_p5 = pnand %p1778_p4, %p1775_p3 }
 0x300   :  { %1783 = shalt.err (!%p1780_p5)
}
 0x301   :  { %1473 = dma.vmem_to_hbm [thread:$0]  %s1468_s8, 4096, %s2906_s7, [#allocation5], %s1798_s1, %s1798_s1, %s1799_s28  }
 0x302   :  { %1790 = dma.done.wait [#allocation5], 4096  }
 0x303   :  { %1791 = vsyncadd [#allocation5], 4294963200 }
 0x304   :  { %1792 = dma.done.wait [#allocation13], 64  }
 0x305   :  { %1793 = vsyncadd [#allocation13], 4294967232 }
 0x306   :  { %1492 = vsyncpa [#allocation4], 1 }
 0x307   :  { %1493 = vsyncpa [#allocation7], 1 }
 0x308   :  { %1494 = vsyncpa [#allocation10], 1 }
 0x309   :  { %1495 = vsyncpa [#allocation5], 1 }
 0x30a   :  { %1496 = vsyncpa [#allocation13], 1 }

</bundles_post_ra>
